<compile_context>
chip_gen: v7x
topology: tpu7x:2x2x1
jax: 0.10.0
libtpu: 0.0.40
codegen_flags: <defaults>
</compile_context>

<pallas_src>
import functools

import jax
import jax.numpy as jnp
import numpy as np
from jax.experimental import pallas as pl
from jax.experimental.pallas import tpu as pltpu

LEAKY_SLOPE = 0.2
BN_EPS = 1e-5


# ---------------------------------------------------------------------------
# Pallas kernel: stacked(conv1+gather+self) -> BN -> LeakyReLU -> conv1x1 ->
#                fused(BN -> LeakyReLU -> max over k)
# Layout: channels on sublanes, edges (neighbour-major, k blocks of P) on lanes.
# ---------------------------------------------------------------------------
def _bn_scale_shift(y, gamma, beta):
    # y: (Cch, M) channels on sublanes, positions on lanes; gamma/beta: (Cch, 1).
    # Biased batch variance (matches PyTorch BN batch stats); clamp >= 0 so a
    # tiny negative one-pass variance can never NaN the rsqrt.
    m = jnp.mean(y, axis=-1, keepdims=True)                       # lane (XLU) reduce
    v = jnp.maximum(jnp.mean(y * y, axis=-1, keepdims=True) - m * m, 0.0)
    scale = gamma * jax.lax.rsqrt(v + BN_EPS)                     # tiny per-channel vec
    shift = beta - m * scale
    return scale, shift


def edge_conv_kernel(xT_ref, xgT_ref, w1_ref, w2_ref,
                     g1_ref, b1_ref, g2_ref, b2_ref, out_ref, *scratch,
                     k, P, has_self_term):
    C = xT_ref.shape[0]

    # ---- conv-1 as ONE stacked matmul contracting 2C (or C) channels ----
    if has_self_term:
        op_ref, = scratch                                         # (2C, k*P) f32 VMEM
        op_ref[0:C, :] = xgT_ref[...].astype(jnp.float32)         # gathered neighbours
        xt = xT_ref[...].astype(jnp.float32)                      # (C, P) self features
        for j in range(k):                                        # k tiny lane-block stores
            op_ref[C:2 * C, j * P:(j + 1) * P] = xt
        y1 = jnp.dot(w1_ref[...], op_ref[...],
                     preferred_element_type=jnp.float32)          # (H, k*P) f32
    else:
        # edge_function == 'global': the self-term weight is identically zero.
        y1 = jnp.dot(w1_ref[...], xgT_ref[...].astype(jnp.float32),
                     preferred_element_type=jnp.float32)          # (H, k*P) f32

    # ---- BN1 (batch stats) + LeakyReLU in scale/shift (single fma) form ----
    s1, t1 = _bn_scale_shift(y1, g1_ref[...], b1_ref[...])
    z1 = y1 * s1 + t1
    z1 = jnp.where(z1 >= 0, z1, LEAKY_SLOPE * z1)                 # (H, k*P) f32

    # ---- conv-2 (1x1) ----
    y2 = jnp.dot(w2_ref[...], z1, preferred_element_type=jnp.float32)  # (Cout, k*P)

    # ---- BN2 stats once, then fused apply + LeakyReLU + max over k ----
    # Never materializes the z2 (Cout, k*P) slab: each of the k lane-blocks is
    # normalized, activated and folded into the (Cout, P) running max.
    s2, t2 = _bn_scale_shift(y2, g2_ref[...], b2_ref[...])
    acc = None
    for j in range(k):
        blk = y2[:, j * P:(j + 1) * P] * s2 + t2
        blk = jnp.where(blk >= 0, blk, LEAKY_SLOPE * blk)
        acc = blk if acc is None else jnp.maximum(acc, blk)
    out_ref[...] = acc                                            # (Cout, P) lane-dense


def edge_conv_pallas(xT, xgT, w1s, w2, g1, b1, g2, b2, *, k, P, has_self_term):
    C = xT.shape[0]
    H = w1s.shape[0]
    Cout = w2.shape[0]
    kern = functools.partial(edge_conv_kernel, k=k, P=P, has_self_term=has_self_term)
    scratch_shapes = ([pltpu.VMEM((2 * C, k * P), jnp.float32)]
                      if has_self_term else [])
    return pl.pallas_call(
        kern,
        out_shape=jax.ShapeDtypeStruct((Cout, P), jnp.float32),
        grid=(1,),
        in_specs=[
            pl.BlockSpec((C, P), lambda i: (0, 0)),               # xT       (bf16)
            pl.BlockSpec((C, k * P), lambda i: (0, 0)),           # xgT      (bf16)
            pl.BlockSpec(w1s.shape, lambda i: (0, 0)),            # W_stk    (f32)
            pl.BlockSpec((Cout, H), lambda i: (0, 0)),            # W2       (f32)
            pl.BlockSpec((H, 1), lambda i: (0, 0)),               # gamma1
            pl.BlockSpec((H, 1), lambda i: (0, 0)),               # beta1
            pl.BlockSpec((Cout, 1), lambda i: (0, 0)),            # gamma2
            pl.BlockSpec((Cout, 1), lambda i: (0, 0)),            # beta2
        ],
        out_specs=pl.BlockSpec((Cout, P), lambda i: (0, 0)),
        scratch_shapes=scratch_shapes,
        compiler_params=pltpu.CompilerParams(
            dimension_semantics=("arbitrary",),
            vmem_limit_bytes=32 * 1024 * 1024,
        ),
    )(xT, xgT, w1s, w2, g1, b1, g2, b2)


# ---------------------------------------------------------------------------
# Plain-JAX glue: cdist / topk / FPS / gather (index plumbing, not the hot path)
# ---------------------------------------------------------------------------
def jax_cdist(a, b):
    a2 = jnp.sum(a * a, axis=-1, keepdims=True)
    b2 = jnp.sum(b * b, axis=-1, keepdims=True)
    d2 = a2 + jnp.swapaxes(b2, -1, -2) - 2.0 * jnp.einsum('bnd,bmd->bnm', a, b)
    return jnp.sqrt(jnp.maximum(d2, 0.0))


def batched_fps(pts, k):
    # pts: (M, S, D) -> (M, k) indices into [0, S)
    # TODO(synk): `fps` in the reference is an external (torch_cluster-style) op with
    # unspecified seed/ratio semantics; here: deterministic batched farthest-point
    # sampling seeded at index 0 (the query point itself).
    M, S, _ = pts.shape

    def dist_to(idx):
        p = jnp.take_along_axis(pts, idx[:, None, None], axis=1)   # (M,1,D)
        return jnp.sum((pts - p) ** 2, axis=-1)                    # (M,S)

    sel = jnp.zeros((M, k), jnp.int32)
    dist = dist_to(jnp.zeros((M,), jnp.int32))

    def body(i, carry):
        sel, dist = carry
        nxt = jnp.argmax(dist, axis=1).astype(jnp.int32)
        sel = sel.at[:, i].set(nxt)
        dist = jnp.minimum(dist, dist_to(nxt))
        return sel, dist

    sel, _ = jax.lax.fori_loop(1, k, body, (sel, dist))
    return sel


def _stack_conv1_weight(w1, C, edge_function):
    """Return (W_stk, has_self_term) with y1 = W_stk @ [x_gather ; x_self]."""
    if edge_function == 'global':
        return w1, False                                           # (H, C)
    if edge_function == 'local':
        return jnp.concatenate([w1, -w1], axis=1), True            # (H, 2C)
    if edge_function == 'local_global':
        w_loc = w1[:, :C]
        w_glob = w1[:, C:]
        return jnp.concatenate([w_loc, w_glob - w_loc], axis=1), True
    raise ValueError(edge_function)


def get_graph_feature_jax(x_bnc, idx, edge_function):
    # Reference-only helper (mirrors the PyTorch get_graph_feature); the kernel
    # path never materializes this k-duplicated concatenated slab.
    B, N, C = x_bnc.shape
    k = idx.shape[-1]
    idx_base = (jnp.arange(B, dtype=idx.dtype) * N)[:, None, None]
    idx_flat = (idx + idx_base).reshape(-1)
    x_flat = x_bnc.reshape(B * N, C)
    feature = x_flat[idx_flat].reshape(B, N, k, C)
    x_rep = x_bnc[:, :, None, :]
    if edge_function == 'global':
        feat = feature
    elif edge_function == 'local':
        feat = feature - x_rep
    elif edge_function == 'local_global':
        feat = jnp.concatenate(
            [feature - x_rep, jnp.broadcast_to(x_rep, feature.shape)], axis=3)
    else:
        raise ValueError(edge_function)
    return feat


def dilated_edge_graph_conv_block(x, pos, params, *, edge_function, dilation_k, k):
    """x: (B, N, C), pos: (B, N, D) -> (out (B, N, Cout), idx (B, N, k))."""
    if dilation_k < k:
        raise ValueError(f'Dilation k {dilation_k} must be larger than k {k}')
    B, N, C = x.shape
    P = B * N
    if P % 128 != 0:
        # TODO(synk): pad P to a lane multiple and mask the padded columns out of
        # the BN batch statistics; not needed at the demo shape (P = 128).
        raise NotImplementedError('B*N must be a multiple of 128')

    cd = jax_cdist(pos, pos)                                       # (B, N, N)
    dk = min(dilation_k, N)
    idx_l = jax.lax.top_k(-cd, dk)[1].reshape(B * N, dk)           # ascending distances
    # Reproduce reference exactly: indices in [0, N) index the *flattened* (B*N, D)
    # pos, i.e. FPS sees batch-0 coordinates for every row (as the PyTorch code does).
    pts = pos.reshape(B * N, -1)[idx_l]                            # (B*N, dk, D)
    idx_fps_local = batched_fps(pts, k)                            # (B*N, k) in [0, dk)
    idx_fps = jnp.take_along_axis(idx_l, idx_fps_local, axis=1).reshape(B, N, k)

    # ---- kernel-side layout: channels on sublanes, edges (k-major) on lanes ----
    # Gather directly in the (C, k*P) layout from the bf16 xT (no (k*P, C) slab
    # and no wrapper transpose of the gathered features).
    xT = x.reshape(P, C).T.astype(jnp.bfloat16)                    # (C, P)
    gidx = idx_fps + (jnp.arange(B, dtype=idx_fps.dtype) * N)[:, None, None]  # (B,N,k)
    gidx_flat = gidx.reshape(P, k).T.reshape(-1)                   # (k*P,) neighbour-major
    xgT = jnp.take(xT, gidx_flat, axis=1)                          # (C, k*P) bf16

    w1, g1, b1, w2, g2, b2 = params
    Cout = w2.shape[0]
    w1s, has_self_term = _stack_conv1_weight(w1, C, edge_function)

    out_t = edge_conv_pallas(
        xT, xgT,
        w1s.astype(jnp.float32), w2.astype(jnp.float32),
        g1.reshape(-1, 1).astype(jnp.float32), b1.reshape(-1, 1).astype(jnp.float32),
        g2.reshape(-1, 1).astype(jnp.float32), b2.reshape(-1, 1).astype(jnp.float32),
        k=k, P=P, has_self_term=has_self_term)                     # (Cout, P)
    # TODO(synk): drop this HBM transpose pass if the downstream block can consume
    # the channels-on-sublane (Cout, P) layout directly.
    out = out_t.T.reshape(B, N, Cout)
    return out, idx_fps


# pure-JAX f32 reference of the conv stack (unfused form) for a sanity check
def _conv_ref(x, idx_fps, params, edge_function):
    w1, g1, b1, w2, g2, b2 = params
    feat = get_graph_feature_jax(x, idx_fps, edge_function)        # (B, N, k, Cin)
    B, N, k, Cin = feat.shape
    f2 = jnp.transpose(feat, (2, 0, 1, 3)).reshape(k * B * N, Cin)

    def bn_leaky(y, g, bta):
        m = jnp.mean(y, axis=0, keepdims=True)
        v = jnp.mean(y * y, axis=0, keepdims=True) - m * m
        z = (y - m) / jnp.sqrt(v + BN_EPS) * g + bta
        return jnp.where(z >= 0, z, LEAKY_SLOPE * z)

    z1 = bn_leaky(f2 @ w1.T, g1, b1)
    z2 = bn_leaky(z1 @ w2.T, g2, b2)
    return jnp.max(z2.reshape(k, B * N, -1), axis=0).reshape(B, N, -1)


if __name__ == "__main__":
    B, N, C, D = 2, 64, 4, 3
    hidden, out_ch = 32, 32
    dilation_k, k = 16, 8
    edge_function = 'local_global'
    cin_eff = 2 * C if edge_function == 'local_global' else C

    key = jax.random.PRNGKey(0)
    kx, kp, kw1, kw2 = jax.random.split(key, 4)
    x = jax.random.normal(kx, (B, N, C), jnp.float32)
    pos = jax.random.normal(kp, (B, N, D), jnp.float32)

    # deterministic parameter init (Conv2d weights ~ U(-1/sqrt(fan_in), 1/sqrt(fan_in)),
    # BatchNorm gamma=1, beta=0 as in nn defaults)
    w1 = jax.random.uniform(kw1, (hidden, cin_eff), jnp.float32, -1.0, 1.0) / np.sqrt(cin_eff)
    w2 = jax.random.uniform(kw2, (out_ch, hidden), jnp.float32, -1.0, 1.0) / np.sqrt(hidden)
    g1 = jnp.ones((hidden,), jnp.float32)
    b1 = jnp.zeros((hidden,), jnp.float32)
    g2 = jnp.ones((out_ch,), jnp.float32)
    b2 = jnp.zeros((out_ch,), jnp.float32)
    params = (w1, g1, b1, w2, g2, b2)

    block_fn = jax.jit(functools.partial(
        dilated_edge_graph_conv_block,
        edge_function=edge_function, dilation_k=dilation_k, k=k))
    out, idx = block_fn(x, pos, params)
    out = jax.block_until_ready(out)
    idx = jax.block_until_ready(idx)

    assert out.shape == (B, N, out_ch), out.shape
    assert idx.shape == (B, N, k), idx.shape

    # sanity-check the fused Pallas kernel against the unfused f32 JAX reference
    ref = _conv_ref(x, idx, params, edge_function)
    np.testing.assert_allclose(np.asarray(out), np.asarray(ref), rtol=5e-2, atol=5e-2)

    print("KERNEL_OK")
</pallas_src>

<mosaic_0001>
module attributes {stable_mosaic.version = 11 : i64} {
  func.func @edge_conv_kernel(%arg0: i32, %arg1: memref<4x128xbf16, #tpu.memory_space<vmem>>, %arg2: memref<4x1024xbf16, #tpu.memory_space<vmem>>, %arg3: memref<32x8xf32, #tpu.memory_space<vmem>>, %arg4: memref<32x32xf32, #tpu.memory_space<vmem>>, %arg5: memref<32x1xf32, #tpu.memory_space<vmem>>, %arg6: memref<32x1xf32, #tpu.memory_space<vmem>>, %arg7: memref<32x1xf32, #tpu.memory_space<vmem>>, %arg8: memref<32x1xf32, #tpu.memory_space<vmem>>, %arg9: memref<32x128xf32, #tpu.memory_space<vmem>>, %arg10: memref<8x1024xf32, #tpu.memory_space<vmem>>) attributes {dimension_semantics = [#tpu.dimension_semantics<arbitrary>], iteration_bounds = array<i64: 1>, scalar_prefetch = 0 : i64, scratch_operands = 1 : i64, tpu.core_type = #tpu.core_type<tc>, window_params = [{pipeline_mode = #tpu.pipeline_mode<synchronous>, transform_indices = @transform_0, window_bounds = array<i64: 4, 128>}, {pipeline_mode = #tpu.pipeline_mode<synchronous>, transform_indices = @transform_1, window_bounds = array<i64: 4, 1024>}, {pipeline_mode = #tpu.pipeline_mode<synchronous>, transform_indices = @transform_2, window_bounds = array<i64: 32, 8>}, {pipeline_mode = #tpu.pipeline_mode<synchronous>, transform_indices = @transform_3, window_bounds = array<i64: 32, 32>}, {pipeline_mode = #tpu.pipeline_mode<synchronous>, transform_indices = @transform_4, window_bounds = array<i64: 32, 1>}, {pipeline_mode = #tpu.pipeline_mode<synchronous>, transform_indices = @transform_5, window_bounds = array<i64: 32, 1>}, {pipeline_mode = #tpu.pipeline_mode<synchronous>, transform_indices = @transform_6, window_bounds = array<i64: 32, 1>}, {pipeline_mode = #tpu.pipeline_mode<synchronous>, transform_indices = @transform_7, window_bounds = array<i64: 32, 1>}, {pipeline_mode = #tpu.pipeline_mode<synchronous>, transform_indices = @transform_8, window_bounds = array<i64: 32, 128>}]} {
    %c0 = arith.constant 0 : index
    %c0_0 = arith.constant 0 : index
    %0 = vector.load %arg2[%c0, %c0_0] : memref<4x1024xbf16, #tpu.memory_space<vmem>>, vector<4x1024xbf16>
    %1 = arith.extf %0 : vector<4x1024xbf16> to vector<4x1024xf32>
    %c0_1 = arith.constant 0 : index
    %c0_2 = arith.constant 0 : index
    %2 = vector.load %arg10[%c0_1, %c0_2] : memref<8x1024xf32, #tpu.memory_space<vmem>>, vector<4x1024xf32>
    tpu.vector_store %arg10[%c0_1, %c0_2], %1 {strides = array<i32>} : memref<8x1024xf32, #tpu.memory_space<vmem>>, vector<4x1024xf32>,
    %c0_3 = arith.constant 0 : index
    %c0_4 = arith.constant 0 : index
    %3 = vector.load %arg1[%c0_3, %c0_4] : memref<4x128xbf16, #tpu.memory_space<vmem>>, vector<4x128xbf16>
    %4 = arith.extf %3 : vector<4x128xbf16> to vector<4x128xf32>
    %c4 = arith.constant 4 : index
    %c0_5 = arith.constant 0 : index
    %5 = vector.load %arg10[%c4, %c0_5] : memref<8x1024xf32, #tpu.memory_space<vmem>>, vector<4x128xf32>
    tpu.vector_store %arg10[%c4, %c0_5], %4 {strides = array<i32>} : memref<8x1024xf32, #tpu.memory_space<vmem>>, vector<4x128xf32>,
    %c4_6 = arith.constant 4 : index
    %c128 = arith.constant 128 : index
    %6 = vector.load %arg10[%c4_6, %c128] : memref<8x1024xf32, #tpu.memory_space<vmem>>, vector<4x128xf32>
    tpu.vector_store %arg10[%c4_6, %c128], %4 {strides = array<i32>} : memref<8x1024xf32, #tpu.memory_space<vmem>>, vector<4x128xf32>,
    %c4_7 = arith.constant 4 : index
    %c256 = arith.constant 256 : index
    %7 = vector.load %arg10[%c4_7, %c256] : memref<8x1024xf32, #tpu.memory_space<vmem>>, vector<4x128xf32>
    tpu.vector_store %arg10[%c4_7, %c256], %4 {strides = array<i32>} : memref<8x1024xf32, #tpu.memory_space<vmem>>, vector<4x128xf32>,
    %c4_8 = arith.constant 4 : index
    %c384 = arith.constant 384 : index
    %8 = vector.load %arg10[%c4_8, %c384] : memref<8x1024xf32, #tpu.memory_space<vmem>>, vector<4x128xf32>
    tpu.vector_store %arg10[%c4_8, %c384], %4 {strides = array<i32>} : memref<8x1024xf32, #tpu.memory_space<vmem>>, vector<4x128xf32>,
    %c4_9 = arith.constant 4 : index
    %c512 = arith.constant 512 : index
    %9 = vector.load %arg10[%c4_9, %c512] : memref<8x1024xf32, #tpu.memory_space<vmem>>, vector<4x128xf32>
    tpu.vector_store %arg10[%c4_9, %c512], %4 {strides = array<i32>} : memref<8x1024xf32, #tpu.memory_space<vmem>>, vector<4x128xf32>,
    %c4_10 = arith.constant 4 : index
    %c640 = arith.constant 640 : index
    %10 = vector.load %arg10[%c4_10, %c640] : memref<8x1024xf32, #tpu.memory_space<vmem>>, vector<4x128xf32>
    tpu.vector_store %arg10[%c4_10, %c640], %4 {strides = array<i32>} : memref<8x1024xf32, #tpu.memory_space<vmem>>, vector<4x128xf32>,
    %c4_11 = arith.constant 4 : index
    %c768 = arith.constant 768 : index
    %11 = vector.load %arg10[%c4_11, %c768] : memref<8x1024xf32, #tpu.memory_space<vmem>>, vector<4x128xf32>
    tpu.vector_store %arg10[%c4_11, %c768], %4 {strides = array<i32>} : memref<8x1024xf32, #tpu.memory_space<vmem>>, vector<4x128xf32>,
    %c4_12 = arith.constant 4 : index
    %c896 = arith.constant 896 : index
    %12 = vector.load %arg10[%c4_12, %c896] : memref<8x1024xf32, #tpu.memory_space<vmem>>, vector<4x128xf32>
    tpu.vector_store %arg10[%c4_12, %c896], %4 {strides = array<i32>} : memref<8x1024xf32, #tpu.memory_space<vmem>>, vector<4x128xf32>,
    %c0_13 = arith.constant 0 : index
    %c0_14 = arith.constant 0 : index
    %13 = vector.load %arg3[%c0_13, %c0_14] : memref<32x8xf32, #tpu.memory_space<vmem>>, vector<32x8xf32>
    %c0_15 = arith.constant 0 : index
    %c0_16 = arith.constant 0 : index
    %14 = vector.load %arg10[%c0_15, %c0_16] : memref<8x1024xf32, #tpu.memory_space<vmem>>, vector<8x1024xf32>
    %cst = arith.constant dense<0.000000e+00> : vector<32x1024xf32>
    %15 = tpu.matmul %13, %14, %cst {dimension_numbers = #tpu.dot_dimension_numbers<[1], [0], [0], [1], [0, 0, 1, 1], [], []>} : vector<32x8xf32>, vector<8x1024xf32>, vector<32x1024xf32> -> vector<32x1024xf32>
    %c0_17 = arith.constant 0 : index
    %c0_18 = arith.constant 0 : index
    %16 = vector.load %arg5[%c0_17, %c0_18] : memref<32x1xf32, #tpu.memory_space<vmem>>, vector<32x1xf32>
    %c0_19 = arith.constant 0 : index
    %c0_20 = arith.constant 0 : index
    %17 = vector.load %arg6[%c0_19, %c0_20] : memref<32x1xf32, #tpu.memory_space<vmem>>, vector<32x1xf32>
    %cst_21 = arith.constant dense<0.000000e+00> : vector<32xf32>
    %18 = vector.multi_reduction <add>, %15, %cst_21 [1] : vector<32x1024xf32> to vector<32xf32>
    %19 = vector.shape_cast %18 : vector<32xf32> to vector<32x1xf32>
    %cst_22 = arith.constant 1.024000e+03 : f32
    %20 = vector.broadcast %cst_22 : f32 to vector<32x1xf32>
    %21 = arith.divf %19, %20 : vector<32x1xf32>
    %22 = arith.mulf %15, %15 : vector<32x1024xf32>
    %cst_23 = arith.constant dense<0.000000e+00> : vector<32xf32>
    %23 = vector.multi_reduction <add>, %22, %cst_23 [1] : vector<32x1024xf32> to vector<32xf32>
    %24 = vector.shape_cast %23 : vector<32xf32> to vector<32x1xf32>
    %cst_24 = arith.constant 1.024000e+03 : f32
    %25 = vector.broadcast %cst_24 : f32 to vector<32x1xf32>
    %26 = arith.divf %24, %25 : vector<32x1xf32>
    %27 = arith.mulf %21, %21 : vector<32x1xf32>
    %28 = arith.subf %26, %27 : vector<32x1xf32>
    %cst_25 = arith.constant 0.000000e+00 : f32
    %29 = vector.broadcast %cst_25 : f32 to vector<32x1xf32>
    %30 = arith.maximumf %28, %29 : vector<32x1xf32>
    %cst_26 = arith.constant 9.99999974E-6 : f32
    %31 = vector.broadcast %cst_26 : f32 to vector<32x1xf32>
    %32 = arith.addf %30, %31 : vector<32x1xf32>
    %33 = math.rsqrt %32 : vector<32x1xf32>
    %34 = arith.mulf %16, %33 : vector<32x1xf32>
    %35 = arith.mulf %21, %34 : vector<32x1xf32>
    %36 = arith.subf %17, %35 : vector<32x1xf32>
    %37 = vector.broadcast %34 : vector<32x1xf32> to vector<32x1024xf32>
    %38 = arith.mulf %15, %37 : vector<32x1024xf32>
    %39 = vector.broadcast %36 : vector<32x1xf32> to vector<32x1024xf32>
    %40 = arith.addf %38, %39 : vector<32x1024xf32>
    %cst_27 = arith.constant 0.000000e+00 : f32
    %41 = vector.broadcast %cst_27 : f32 to vector<32x1024xf32>
    %42 = arith.cmpf oge, %40, %41 : vector<32x1024xf32>
    %cst_28 = arith.constant 2.000000e-01 : f32
    %43 = vector.broadcast %cst_28 : f32 to vector<32x1024xf32>
    %44 = arith.mulf %43, %40 : vector<32x1024xf32>
    %45 = arith.select %42, %40, %44 : vector<32x1024xi1>, vector<32x1024xf32>
    %c0_29 = arith.constant 0 : index
    %c0_30 = arith.constant 0 : index
    %46 = vector.load %arg4[%c0_29, %c0_30] : memref<32x32xf32, #tpu.memory_space<vmem>>, vector<32x32xf32>
    %cst_31 = arith.constant dense<0.000000e+00> : vector<32x1024xf32>
    %47 = tpu.matmul %46, %45, %cst_31 {dimension_numbers = #tpu.dot_dimension_numbers<[1], [0], [0], [1], [0, 0, 1, 1], [], []>} : vector<32x32xf32>, vector<32x1024xf32>, vector<32x1024xf32> -> vector<32x1024xf32>
    %c0_32 = arith.constant 0 : index
    %c0_33 = arith.constant 0 : index
    %48 = vector.load %arg7[%c0_32, %c0_33] : memref<32x1xf32, #tpu.memory_space<vmem>>, vector<32x1xf32>
    %c0_34 = arith.constant 0 : index
    %c0_35 = arith.constant 0 : index
    %49 = vector.load %arg8[%c0_34, %c0_35] : memref<32x1xf32, #tpu.memory_space<vmem>>, vector<32x1xf32>
    %cst_36 = arith.constant dense<0.000000e+00> : vector<32xf32>
    %50 = vector.multi_reduction <add>, %47, %cst_36 [1] : vector<32x1024xf32> to vector<32xf32>
    %51 = vector.shape_cast %50 : vector<32xf32> to vector<32x1xf32>
    %cst_37 = arith.constant 1.024000e+03 : f32
    %52 = vector.broadcast %cst_37 : f32 to vector<32x1xf32>
    %53 = arith.divf %51, %52 : vector<32x1xf32>
    %54 = arith.mulf %47, %47 : vector<32x1024xf32>
    %cst_38 = arith.constant dense<0.000000e+00> : vector<32xf32>
    %55 = vector.multi_reduction <add>, %54, %cst_38 [1] : vector<32x1024xf32> to vector<32xf32>
    %56 = vector.shape_cast %55 : vector<32xf32> to vector<32x1xf32>
    %cst_39 = arith.constant 1.024000e+03 : f32
    %57 = vector.broadcast %cst_39 : f32 to vector<32x1xf32>
    %58 = arith.divf %56, %57 : vector<32x1xf32>
    %59 = arith.mulf %53, %53 : vector<32x1xf32>
    %60 = arith.subf %58, %59 : vector<32x1xf32>
    %cst_40 = arith.constant 0.000000e+00 : f32
    %61 = vector.broadcast %cst_40 : f32 to vector<32x1xf32>
    %62 = arith.maximumf %60, %61 : vector<32x1xf32>
    %cst_41 = arith.constant 9.99999974E-6 : f32
    %63 = vector.broadcast %cst_41 : f32 to vector<32x1xf32>
    %64 = arith.addf %62, %63 : vector<32x1xf32>
    %65 = math.rsqrt %64 : vector<32x1xf32>
    %66 = arith.mulf %48, %65 : vector<32x1xf32>
    %67 = arith.mulf %53, %66 : vector<32x1xf32>
    %68 = arith.subf %49, %67 : vector<32x1xf32>
    %69 = vector.extract_strided_slice %47 {offsets = [0, 0], sizes = [32, 128], strides = [1, 1]} : vector<32x1024xf32> to vector<32x128xf32>
    %70 = vector.broadcast %66 : vector<32x1xf32> to vector<32x128xf32>
    %71 = arith.mulf %69, %70 : vector<32x128xf32>
    %72 = vector.broadcast %68 : vector<32x1xf32> to vector<32x128xf32>
    %73 = arith.addf %71, %72 : vector<32x128xf32>
    %cst_42 = arith.constant 0.000000e+00 : f32
    %74 = vector.broadcast %cst_42 : f32 to vector<32x128xf32>
    %75 = arith.cmpf oge, %73, %74 : vector<32x128xf32>
    %cst_43 = arith.constant 2.000000e-01 : f32
    %76 = vector.broadcast %cst_43 : f32 to vector<32x128xf32>
    %77 = arith.mulf %76, %73 : vector<32x128xf32>
    %78 = arith.select %75, %73, %77 : vector<32x128xi1>, vector<32x128xf32>
    %79 = vector.extract_strided_slice %47 {offsets = [0, 128], sizes = [32, 128], strides = [1, 1]} : vector<32x1024xf32> to vector<32x128xf32>
    %80 = vector.broadcast %66 : vector<32x1xf32> to vector<32x128xf32>
    %81 = arith.mulf %79, %80 : vector<32x128xf32>
    %82 = vector.broadcast %68 : vector<32x1xf32> to vector<32x128xf32>
    %83 = arith.addf %81, %82 : vector<32x128xf32>
    %cst_44 = arith.constant 0.000000e+00 : f32
    %84 = vector.broadcast %cst_44 : f32 to vector<32x128xf32>
    %85 = arith.cmpf oge, %83, %84 : vector<32x128xf32>
    %cst_45 = arith.constant 2.000000e-01 : f32
    %86 = vector.broadcast %cst_45 : f32 to vector<32x128xf32>
    %87 = arith.mulf %86, %83 : vector<32x128xf32>
    %88 = arith.select %85, %83, %87 : vector<32x128xi1>, vector<32x128xf32>
    %89 = arith.maximumf %78, %88 : vector<32x128xf32>
    %90 = vector.extract_strided_slice %47 {offsets = [0, 256], sizes = [32, 128], strides = [1, 1]} : vector<32x1024xf32> to vector<32x128xf32>
    %91 = vector.broadcast %66 : vector<32x1xf32> to vector<32x128xf32>
    %92 = arith.mulf %90, %91 : vector<32x128xf32>
    %93 = vector.broadcast %68 : vector<32x1xf32> to vector<32x128xf32>
    %94 = arith.addf %92, %93 : vector<32x128xf32>
    %cst_46 = arith.constant 0.000000e+00 : f32
    %95 = vector.broadcast %cst_46 : f32 to vector<32x128xf32>
    %96 = arith.cmpf oge, %94, %95 : vector<32x128xf32>
    %cst_47 = arith.constant 2.000000e-01 : f32
    %97 = vector.broadcast %cst_47 : f32 to vector<32x128xf32>
    %98 = arith.mulf %97, %94 : vector<32x128xf32>
    %99 = arith.select %96, %94, %98 : vector<32x128xi1>, vector<32x128xf32>
    %100 = arith.maximumf %89, %99 : vector<32x128xf32>
    %101 = vector.extract_strided_slice %47 {offsets = [0, 384], sizes = [32, 128], strides = [1, 1]} : vector<32x1024xf32> to vector<32x128xf32>
    %102 = vector.broadcast %66 : vector<32x1xf32> to vector<32x128xf32>
    %103 = arith.mulf %101, %102 : vector<32x128xf32>
    %104 = vector.broadcast %68 : vector<32x1xf32> to vector<32x128xf32>
    %105 = arith.addf %103, %104 : vector<32x128xf32>
    %cst_48 = arith.constant 0.000000e+00 : f32
    %106 = vector.broadcast %cst_48 : f32 to vector<32x128xf32>
    %107 = arith.cmpf oge, %105, %106 : vector<32x128xf32>
    %cst_49 = arith.constant 2.000000e-01 : f32
    %108 = vector.broadcast %cst_49 : f32 to vector<32x128xf32>
    %109 = arith.mulf %108, %105 : vector<32x128xf32>
    %110 = arith.select %107, %105, %109 : vector<32x128xi1>, vector<32x128xf32>
    %111 = arith.maximumf %100, %110 : vector<32x128xf32>
    %112 = vector.extract_strided_slice %47 {offsets = [0, 512], sizes = [32, 128], strides = [1, 1]} : vector<32x1024xf32> to vector<32x128xf32>
    %113 = vector.broadcast %66 : vector<32x1xf32> to vector<32x128xf32>
    %114 = arith.mulf %112, %113 : vector<32x128xf32>
    %115 = vector.broadcast %68 : vector<32x1xf32> to vector<32x128xf32>
    %116 = arith.addf %114, %115 : vector<32x128xf32>
    %cst_50 = arith.constant 0.000000e+00 : f32
    %117 = vector.broadcast %cst_50 : f32 to vector<32x128xf32>
    %118 = arith.cmpf oge, %116, %117 : vector<32x128xf32>
    %cst_51 = arith.constant 2.000000e-01 : f32
    %119 = vector.broadcast %cst_51 : f32 to vector<32x128xf32>
    %120 = arith.mulf %119, %116 : vector<32x128xf32>
    %121 = arith.select %118, %116, %120 : vector<32x128xi1>, vector<32x128xf32>
    %122 = arith.maximumf %111, %121 : vector<32x128xf32>
    %123 = vector.extract_strided_slice %47 {offsets = [0, 640], sizes = [32, 128], strides = [1, 1]} : vector<32x1024xf32> to vector<32x128xf32>
    %124 = vector.broadcast %66 : vector<32x1xf32> to vector<32x128xf32>
    %125 = arith.mulf %123, %124 : vector<32x128xf32>
    %126 = vector.broadcast %68 : vector<32x1xf32> to vector<32x128xf32>
    %127 = arith.addf %125, %126 : vector<32x128xf32>
    %cst_52 = arith.constant 0.000000e+00 : f32
    %128 = vector.broadcast %cst_52 : f32 to vector<32x128xf32>
    %129 = arith.cmpf oge, %127, %128 : vector<32x128xf32>
    %cst_53 = arith.constant 2.000000e-01 : f32
    %130 = vector.broadcast %cst_53 : f32 to vector<32x128xf32>
    %131 = arith.mulf %130, %127 : vector<32x128xf32>
    %132 = arith.select %129, %127, %131 : vector<32x128xi1>, vector<32x128xf32>
    %133 = arith.maximumf %122, %132 : vector<32x128xf32>
    %134 = vector.extract_strided_slice %47 {offsets = [0, 768], sizes = [32, 128], strides = [1, 1]} : vector<32x1024xf32> to vector<32x128xf32>
    %135 = vector.broadcast %66 : vector<32x1xf32> to vector<32x128xf32>
    %136 = arith.mulf %134, %135 : vector<32x128xf32>
    %137 = vector.broadcast %68 : vector<32x1xf32> to vector<32x128xf32>
    %138 = arith.addf %136, %137 : vector<32x128xf32>
    %cst_54 = arith.constant 0.000000e+00 : f32
    %139 = vector.broadcast %cst_54 : f32 to vector<32x128xf32>
    %140 = arith.cmpf oge, %138, %139 : vector<32x128xf32>
    %cst_55 = arith.constant 2.000000e-01 : f32
    %141 = vector.broadcast %cst_55 : f32 to vector<32x128xf32>
    %142 = arith.mulf %141, %138 : vector<32x128xf32>
    %143 = arith.select %140, %138, %142 : vector<32x128xi1>, vector<32x128xf32>
    %144 = arith.maximumf %133, %143 : vector<32x128xf32>
    %145 = vector.extract_strided_slice %47 {offsets = [0, 896], sizes = [32, 128], strides = [1, 1]} : vector<32x1024xf32> to vector<32x128xf32>
    %146 = vector.broadcast %66 : vector<32x1xf32> to vector<32x128xf32>
    %147 = arith.mulf %145, %146 : vector<32x128xf32>
    %148 = vector.broadcast %68 : vector<32x1xf32> to vector<32x128xf32>
    %149 = arith.addf %147, %148 : vector<32x128xf32>
    %cst_56 = arith.constant 0.000000e+00 : f32
    %150 = vector.broadcast %cst_56 : f32 to vector<32x128xf32>
    %151 = arith.cmpf oge, %149, %150 : vector<32x128xf32>
    %cst_57 = arith.constant 2.000000e-01 : f32
    %152 = vector.broadcast %cst_57 : f32 to vector<32x128xf32>
    %153 = arith.mulf %152, %149 : vector<32x128xf32>
    %154 = arith.select %151, %149, %153 : vector<32x128xi1>, vector<32x128xf32>
    %155 = arith.maximumf %144, %154 : vector<32x128xf32>
    %c0_58 = arith.constant 0 : index
    %c0_59 = arith.constant 0 : index
    %156 = vector.load %arg9[%c0_58, %c0_59] : memref<32x128xf32, #tpu.memory_space<vmem>>, vector<32x128xf32>
    tpu.vector_store %arg9[%c0_58, %c0_59], %155 {strides = array<i32>} : memref<32x128xf32, #tpu.memory_space<vmem>>, vector<32x128xf32>,
    return
  }
  func.func @transform_0(%arg0: i32) -> (i32, i32) {
    %c0_i32 = arith.constant 0 : i32
    %c0_i32_0 = arith.constant 0 : i32
    %c0_i32_1 = arith.constant 0 : i32
    return %c0_i32, %c0_i32_0 : i32, i32
  }
  func.func @transform_1(%arg0: i32) -> (i32, i32) {
    %c0_i32 = arith.constant 0 : i32
    %c0_i32_0 = arith.constant 0 : i32
    %c0_i32_1 = arith.constant 0 : i32
    return %c0_i32, %c0_i32_0 : i32, i32
  }
  func.func @transform_2(%arg0: i32) -> (i32, i32) {
    %c0_i32 = arith.constant 0 : i32
    %c0_i32_0 = arith.constant 0 : i32
    %c0_i32_1 = arith.constant 0 : i32
    return %c0_i32, %c0_i32_0 : i32, i32
  }
  func.func @transform_3(%arg0: i32) -> (i32, i32) {
    %c0_i32 = arith.constant 0 : i32
    %c0_i32_0 = arith.constant 0 : i32
    %c0_i32_1 = arith.constant 0 : i32
    return %c0_i32, %c0_i32_0 : i32, i32
  }
  func.func @transform_4(%arg0: i32) -> (i32, i32) {
    %c0_i32 = arith.constant 0 : i32
    %c0_i32_0 = arith.constant 0 : i32
    %c0_i32_1 = arith.constant 0 : i32
    return %c0_i32, %c0_i32_0 : i32, i32
  }
  func.func @transform_5(%arg0: i32) -> (i32, i32) {
    %c0_i32 = arith.constant 0 : i32
    %c0_i32_0 = arith.constant 0 : i32
    %c0_i32_1 = arith.constant 0 : i32
    return %c0_i32, %c0_i32_0 : i32, i32
  }
  func.func @transform_6(%arg0: i32) -> (i32, i32) {
    %c0_i32 = arith.constant 0 : i32
    %c0_i32_0 = arith.constant 0 : i32
    %c0_i32_1 = arith.constant 0 : i32
    return %c0_i32, %c0_i32_0 : i32, i32
  }
  func.func @transform_7(%arg0: i32) -> (i32, i32) {
    %c0_i32 = arith.constant 0 : i32
    %c0_i32_0 = arith.constant 0 : i32
    %c0_i32_1 = arith.constant 0 : i32
    return %c0_i32, %c0_i32_0 : i32, i32
  }
  func.func @transform_8(%arg0: i32) -> (i32, i32) {
    %c0_i32 = arith.constant 0 : i32
    %c0_i32_0 = arith.constant 0 : i32
    %c0_i32_1 = arith.constant 0 : i32
    return %c0_i32, %c0_i32_0 : i32, i32
  }
}

</mosaic_0001>

<bundles_post_ra>
// kernel: dilated_edge_graph_conv_block.1
= control target key start
LH: loop header
LB: loop body
LE: loop exit
PB: predicated region body
PF: predicated region fallthrough
CT: control target
= control target key end

     0   :  { %v1647_v2 = vmov 0.0   ;;  %vm80_vm0 = vcmask 64512   ;;  %s2332_s0 = inlined_call_operand.vmem [shape: bf16[4,128], index: 0, kind: input, shape index: {}]   ;;  %s2333_s1 = inlined_call_operand.vmem [shape: bf16[4,1024], index: 1, kind: input, shape index: {}]   ;;  %s2334_s2 = inlined_call_operand.vmem [shape: f32[32,8], index: 2, kind: input, shape index: {}]   ;;  %s2335_s4 = inlined_call_operand.vmem [shape: f32[32,1], index: 4, kind: input, shape index: {}]   ;;  %s2336_s5 = inlined_call_operand.vmem [shape: f32[32,1], index: 5, kind: input, shape index: {}]   ;;  %s2337_s3 = inlined_call_operand.vmem [shape: f32[32,32], index: 3, kind: input, shape index: {}]   ;;  %s2338_s6 = inlined_call_operand.vmem [shape: f32[32,1], index: 6, kind: input, shape index: {}]   ;;  %s2339_s7 = inlined_call_operand.vmem [shape: f32[32,1], index: 7, kind: input, shape index: {}]   ;;  %s2340_s8 = inlined_call_operand.vmem [shape: f32[32,128], index: 8, kind: output, shape index: {}]  }
   0x1   :  { %v29_v0 = vld [vmem:[%s2333_s1] sm:$0xff]  ;;  %157 = vmatprep.mubr.f32.mxu0 %v1647_v2  ;;  %246 = vmatprep.mubr.f32.mxu1 %v1647_v2  ;;  %v30_v6 = vld [vmem:[%s2333_s1 + $0x8] sm:$0xff]  ;;  %v70_v24 = vld [vmem:[%s2334_s2 + $0x10] sm:$0xff] }
   0x2   :  { %v55_v1 = vld [vmem:[%s2332_s0] sm:$0x3]  ;;  %v31_v3 = vunpack.c.l.bf16 %v29_v0  ;;  %v32_v5 = vunpack.c.h.bf16 %v29_v0  ;;  %v33_v7 = vunpack.c.l.bf16 %v30_v6  ;;  %v34_v8 = vunpack.c.h.bf16 %v30_v6  ;;  %v69_v22 = vld [vmem:[%s2334_s2 + $0x8] sm:$0xff]  ;;  %v71_v25 = vld [vmem:[%s2334_s2 + $0x18] sm:$0xff] }
   0x3   :  { %v56_v4 = vunpack.c.l.bf16 %v55_v1  ;;  %v68_v14 = vld [vmem:[%s2334_s2] sm:$0xff] }
   0x4   :  { %v39_v9 = vcombine.high %v31_v3, %v31_v3  ;;  %47 = vst [vmem:[#allocation2] sm:$0xf] %v31_v3  ;;  %v40_v11 = vcombine.high %v32_v5, %v32_v5  ;;  %49 = vst [vmem:[#allocation2 + $0x10] sm:$0xf] %v32_v5  ;;  %v41_v12 = vcombine.high %v33_v7, %v33_v7 }
   0x5   :  { %v58_v10 = vcombine.low %v56_v4, %v56_v4  ;;  %51 = vst [vmem:[#allocation2 + $0x20] sm:$0xf] %v33_v7  ;;  %v42_v13 = vcombine.high %v34_v8, %v34_v8  ;;  %53 = vst [vmem:[#allocation2 + $0x30] sm:$0xf] %v34_v8 }
   0x6   :  { %48 = vst [vmem:[#allocation2 + $0x8] sm:$0xf] %v39_v9  ;;  %50 = vst [vmem:[#allocation2 + $0x18] sm:$0xf] %v40_v11 }
   0x7   :  { %61 = vst [vmem:[#allocation2 + $0x8] sm:$0xf0] %v58_v10  ;;  %60 = vst [vmem:[#allocation2] sm:$0xf0] %v58_v10 }
   0x8   :  { %62 = vst [vmem:[#allocation2 + $0x10] sm:$0xf0] %v58_v10  ;;  %63 = vst [vmem:[#allocation2 + $0x18] sm:$0xf0] %v58_v10 }
   0x9   :  { %64 = vst [vmem:[#allocation2 + $0x20] sm:$0xf0] %v58_v10  ;;  %65 = vst [vmem:[#allocation2 + $0x28] sm:$0xf0] %v58_v10 }
   0xa   :  { %66 = vst [vmem:[#allocation2 + $0x30] sm:$0xf0] %v58_v10  ;;  %67 = vst [vmem:[#allocation2 + $0x38] sm:$0xf0] %v58_v10 }
   0xb   :  { %52 = vst [vmem:[#allocation2 + $0x28] sm:$0xf] %v41_v12  ;;  %54 = vst [vmem:[#allocation2 + $0x38] sm:$0xf] %v42_v13 }
   0xe   :  { %v73_v15 = vld [vmem:[#allocation2 + $0x8] sm:$0xff]  ;;  %v72_v16 = vld [vmem:[#allocation2] sm:$0xff] }
   0xf   :  { %v75_v17 = vld [vmem:[#allocation2 + $0x18] sm:$0xff]  ;;  %93 = vmatprep.subr.mxu0 %v73_v15  ;;  %v74_v18 = vld [vmem:[#allocation2 + $0x10] sm:$0xff] }
  0x10   :  { %182 = vmatprep.subr.mxu1 %v75_v17  ;;  %94 = vmatpush1.msra.mxu0 %v72_v16  ;;  %v76_v20 = vld [vmem:[#allocation2 + $0x20] sm:$0xff] }
  0x11   :  { %183 = vmatpush1.msra.mxu1 %v74_v18  ;;  %1563 = vmatmul.mubr.msk.f32.vlgmr.msra.gmra.mrb[0].mxu0 %vm80_vm0, %v68_v14  ;;  %v78_v23 = vld [vmem:[#allocation2 + $0x30] sm:$0xff] }
  0x12   :  { %v77_v19 = vld [vmem:[#allocation2 + $0x28] sm:$0xff]  ;;  %1567 = vmatmul.mubr.msk.f32.vlgmr.msra.gmra.mrb[0].mxu1 %vm80_vm0, %v68_v14  ;;  %v79_v21 = vld [vmem:[#allocation2 + $0x38] sm:$0xff]  ;;  %163 = vmatprep.mubr.f32.mxu0 %v1647_v2 }
  0x13   :  { %271 = vmatprep.subr.mxu0 %v77_v19  ;;  %252 = vmatprep.mubr.f32.mxu1 %v1647_v2 }
  0x14   :  { %272 = vmatpush1.msra.mxu0 %v76_v20  ;;  %360 = vmatprep.subr.mxu1 %v79_v21 }
  0x15   :  { %1564 = vmatmul.mubr.msk.f32.gmra.mrb[2].mxu0 %vm80_vm0, %v69_v22  ;;  %361 = vmatpush1.msra.mxu1 %v78_v23 }
  0x16   :  { %1568 = vmatmul.mubr.msk.f32.gmra.mrb[2].mxu1 %vm80_vm0, %v69_v22  ;;  %169 = vmatprep.mubr.f32.mxu0 %v1647_v2 }
  0x17   :  { %258 = vmatprep.mubr.f32.mxu1 %v1647_v2 }
  0x19   :  { %1565 = vmatmul.mubr.msk.f32.gmra.mrb[4].mxu0 %vm80_vm0, %v70_v24 }
  0x1a   :  { %1569 = vmatmul.mubr.msk.f32.gmra.mrb[4].mxu1 %vm80_vm0, %v70_v24  ;;  %175 = vmatprep.mubr.f32.mxu0 %v1647_v2 }
  0x1b   :  { %264 = vmatprep.mubr.f32.mxu1 %v1647_v2 }
  0x1d   :  { %1566 = vmatmul.mubr.msk.f32.gmra.mrb[6].mxu0 %vm80_vm0, %v71_v25 }
  0x1e   :  { %1570 = vmatmul.mubr.msk.f32.gmra.mrb[6].mxu1 %vm80_vm0, %v71_v25  ;;  %335 = vmatprep.mubr.f32.mxu0 %v1647_v2 }
  0x1f   :  { %424 = vmatprep.mubr.f32.mxu1 %v1647_v2 }
  0x21   :  { %1571 = vmatmul.mubr.msk.f32.vlgmr.msra.gmra.mrb[8].mxu0 %vm80_vm0, %v68_v14 }
  0x22   :  { %1575 = vmatmul.mubr.msk.f32.vlgmr.msra.gmra.mrb[8].mxu1 %vm80_vm0, %v68_v14  ;;  %341 = vmatprep.mubr.f32.mxu0 %v1647_v2 }
  0x23   :  { %430 = vmatprep.mubr.f32.mxu1 %v1647_v2 }
  0x25   :  { %1572 = vmatmul.mubr.msk.f32.gmra.mrb[10].mxu0 %vm80_vm0, %v69_v22 }
  0x26   :  { %1576 = vmatmul.mubr.msk.f32.gmra.mrb[10].mxu1 %vm80_vm0, %v69_v22  ;;  %347 = vmatprep.mubr.f32.mxu0 %v1647_v2 }
  0x27   :  { %436 = vmatprep.mubr.f32.mxu1 %v1647_v2 }
  0x29   :  { %1573 = vmatmul.mubr.msk.f32.gmra.mrb[12].mxu0 %vm80_vm0, %v70_v24 }
  0x2a   :  { %1577 = vmatmul.mubr.msk.f32.gmra.mrb[12].mxu1 %vm80_vm0, %v70_v24  ;;  %353 = vmatprep.mubr.f32.mxu0 %v1647_v2 }
  0x2b   :  { %442 = vmatprep.mubr.f32.mxu1 %v1647_v2 }
  0x2d   :  { %1574 = vmatmul.mubr.msk.f32.gmra.mrb[14].mxu0 %vm80_vm0, %v71_v25 }
  0x2e   :  { %1578 = vmatmul.mubr.msk.f32.gmra.mrb[14].mxu1 %vm80_vm0, %v71_v25  ;;  %883 = vmatprep.mubr.f32.mxu0 %v1647_v2 }
  0x2f   :  { %972 = vmatprep.mubr.f32.mxu1 %v1647_v2 }
  0xe4   :  { %v1749_v26 = vpop.f32.mrb[0].mxu0 }
  0xe5   :  { %v1751_v27 = vpop.f32.mrb[0].mxu1  ;;  %v498_v28 = vmul.f32 %v1749_v26, %v1749_v26  ;;  %v1755_v29 = vpop.f32.mrb[1].mxu0 }
  0xe6   :  { %v1757_v30 = vpop.f32.mrb[1].mxu1  ;;  %v457_v31 = vadd.f32 %v1755_v29, %v1749_v26  ;;  %v499_v32 = vmul.f32 %v1755_v29, %v1755_v29  ;;  %v500_v33 = vmul.f32 %v1751_v27, %v1751_v27 }
  0xe7   :  { %v501_v37 = vmul.f32 %v1757_v30, %v1757_v30 }
  0xe8   :  { %v530_v34 = vadd.f32 %v499_v32, %v498_v28  ;;  %v458_v35 = vadd.f32 %v457_v31, %v1751_v27  ;;  %v1766_v36 = vpop.f32.mrb[2].mxu0 }
  0xe9   :  { %v1770_v38 = vpop.f32.mrb[2].mxu1  ;;  %v506_v39 = vmul.f32 %v1766_v36, %v1766_v36  ;;  %v1774_v40 = vpop.f32.mrb[3].mxu0 }
  0xea   :  { %v508_v41 = vmul.f32 %v1770_v38, %v1770_v38  ;;  %v1778_v42 = vpop.f32.mrb[3].mxu1  ;;  %v531_v43 = vadd.f32 %v530_v34, %v500_v33  ;;  %v459_v44 = vadd.f32 %v458_v35, %v1757_v30  ;;  %v466_v45 = vadd.f32 %v1774_v40, %v1766_v36 }
  0xeb   :  { %v507_v46 = vmul.f32 %v1774_v40, %v1774_v40  ;;  %v509_v51 = vmul.f32 %v1778_v42, %v1778_v42 }
  0xec   :  { %v532_v47 = vadd.f32 %v531_v43, %v501_v37  ;;  %v467_v49 = vadd.f32 %v466_v45, %v1770_v38  ;;  %v1786_v50 = vpop.f32.mrb[4].mxu0 }
  0xed   :  { %v539_v48 = vadd.f32 %v507_v46, %v506_v39  ;;  %v1790_v52 = vpop.f32.mrb[4].mxu1  ;;  %v514_v53 = vmul.f32 %v1786_v50, %v1786_v50  ;;  %v1794_v54 = vpop.f32.mrb[5].mxu0 }
  0xee   :  { %v516_v55 = vmul.f32 %v1790_v52, %v1790_v52  ;;  %v1798_v56 = vpop.f32.mrb[5].mxu1  ;;  %v468_v58 = vadd.f32 %v467_v49, %v1778_v42  ;;  %v475_v59 = vadd.f32 %v1794_v54, %v1786_v50  ;;  %v515_v60 = vmul.f32 %v1794_v54, %v1794_v54 }
  0xef   :  { %v540_v57 = vadd.f32 %v539_v48, %v508_v41  ;;  %v517_v1 = vmul.f32 %v1798_v56, %v1798_v56 }
  0xf0   :  { %v548_v62 = vadd.f32 %v515_v60, %v514_v53  ;;  %v476_v63 = vadd.f32 %v475_v59, %v1790_v52  ;;  %v1806_v0 = vpop.f32.mrb[6].mxu0 }
  0xf1   :  { %v541_v61 = vadd.f32 %v540_v57, %v509_v51  ;;  %v1810_v3 = vpop.f32.mrb[6].mxu1  ;;  %v522_v4 = vmul.f32 %v1806_v0, %v1806_v0  ;;  %v1814_v5 = vpop.f32.mrb[7].mxu0 }
  0xf2   :  { %v524_v6 = vmul.f32 %v1810_v3, %v1810_v3  ;;  %v1818_v7 = vpop.f32.mrb[7].mxu1  ;;  %v549_v8 = vadd.f32 %v548_v62, %v516_v55  ;;  %v477_v9 = vadd.f32 %v476_v63, %v1798_v56  ;;  %v484_v10 = vadd.f32 %v1814_v5, %v1806_v0 }
  0xf3   :  { %v523_v11 = vmul.f32 %v1814_v5, %v1814_v5  ;;  %v525_v15 = vmul.f32 %v1818_v7, %v1818_v7 }
  0xf4   :  { %v550_v12 = vadd.f32 %v549_v8, %v517_v1  ;;  %v485_v14 = vadd.f32 %v484_v10, %v1810_v3  ;;  %v1828_v16 = vpop.f32.mrb[8].mxu0 }
  0xf5   :  { %v557_v13 = vadd.f32 %v523_v11, %v522_v4  ;;  %v1830_v17 = vpop.f32.mrb[8].mxu1  ;;  %v460_v18 = vadd.f32 %v459_v44, %v1828_v16  ;;  %v502_v19 = vmul.f32 %v1828_v16, %v1828_v16  ;;  %v1835_v20 = vpop.f32.mrb[9].mxu0 }
  0xf6   :  { %v1837_v21 = vpop.f32.mrb[9].mxu1  ;;  %v486_v23 = vadd.f32 %v485_v14, %v1818_v7  ;;  %v503_v24 = vmul.f32 %v1835_v20, %v1835_v20  ;;  %v504_v32 = vmul.f32 %v1830_v17, %v1830_v17 }
  0xf7   :  { %v558_v22 = vadd.f32 %v557_v13, %v524_v6  ;;  %v533_v25 = vadd.f32 %v532_v47, %v502_v19  ;;  %v461_v28 = vadd.f32 %v460_v18, %v1835_v20  ;;  %v505_v53 = vmul.f32 %v1837_v21, %v1837_v21 }
  0xf8   :  { %v1845_v33 = vpop.f32.mrb[10].mxu0 }
  0xf9   :  { %v559_v31 = vadd.f32 %v558_v22, %v525_v15  ;;  %v1847_v34 = vpop.f32.mrb[10].mxu1  ;;  %v469_v35 = vadd.f32 %v468_v58, %v1845_v33  ;;  %v510_v37 = vmul.f32 %v1845_v33, %v1845_v33  ;;  %v1852_v39 = vpop.f32.mrb[11].mxu0  ;;  %v462_v43 = vadd.f32 %v461_v28, %v1830_v17 }
  0xfa   :  { %v1854_v41 = vpop.f32.mrb[11].mxu1  ;;  %v511_v44 = vmul.f32 %v1852_v39, %v1852_v39  ;;  %v534_v45 = vadd.f32 %v533_v25, %v503_v24  ;;  %v512_v49 = vmul.f32 %v1847_v34, %v1847_v34 }
  0xfb   :  { %v542_v46 = vadd.f32 %v541_v61, %v510_v37  ;;  %v470_v47 = vadd.f32 %v469_v35, %v1852_v39  ;;  %v463_v48 = vadd.f32 %v462_v43, %v1837_v21  ;;  %v513_v13 = vmul.f32 %v1854_v41, %v1854_v41 }
  0xfc   :  { %v1863_v51 = vpop.f32.mrb[12].mxu0  ;;  %v535_v55 = vadd.f32 %v534_v45, %v504_v32 }
  0xfd   :  { %v1867_v57 = vpop.f32.mrb[12].mxu1  ;;  %v478_v58 = vadd.f32 %v477_v9, %v1863_v51  ;;  %v518_v59 = vmul.f32 %v1863_v51, %v1863_v51  ;;  %464 = vadd.xlane.f32.xlu0 %v463_v48  ;;  %v1872_v60 = vpop.f32.mrb[13].mxu0  ;;  %v471_v61 = vadd.f32 %v470_v47, %v1847_v34  ;;  %v543_v4 = vadd.f32 %v542_v46, %v511_v44 }
  0xfe   :  { %v1875_v62 = vpop.f32.mrb[13].mxu1  ;;  %v519_v63 = vmul.f32 %v1872_v60, %v1872_v60  ;;  %v536_v1 = vadd.f32 %v535_v55, %v505_v53  ;;  %v520_v11 = vmul.f32 %v1867_v57, %v1867_v57 }
  0xff   :  { %v551_v6 = vadd.f32 %v550_v12, %v518_v59  ;;  %v479_v8 = vadd.f32 %v478_v58, %v1872_v60  ;;  %v472_v9 = vadd.f32 %v471_v61, %v1854_v41  ;;  %v544_v14 = vadd.f32 %v543_v4, %v512_v49 }
 0x100   :  { %537 = vadd.xlane.f32.xlu1 %v536_v1  ;;  %v1881_v10 = vpop.f32.mrb[14].mxu0  ;;  %v521_v32 = vmul.f32 %v1875_v62, %v1875_v62  ;;  %v1648_v58 = vmov 0  }
 0x101   :  { %v1887_v15 = vpop.f32.mrb[14].mxu1  ;;  %v487_v18 = vadd.f32 %v486_v23, %v1881_v10  ;;  %v526_v12 = vmul.f32 %v1881_v10, %v1881_v10  ;;  %473 = vadd.xlane.f32.xlu0 %v472_v9  ;;  %v1892_v19 = vpop.f32.mrb[15].mxu0  ;;  %v480_v22 = vadd.f32 %v479_v8, %v1867_v57  ;;  %v545_v28 = vadd.f32 %v544_v14, %v513_v13 }
 0x102   :  { %v1895_v24 = vpop.f32.mrb[15].mxu1  ;;  %v527_v25 = vmul.f32 %v1892_v19, %v1892_v19  ;;  %v552_v35 = vadd.f32 %v551_v6, %v519_v63  ;;  %v528_v43 = vmul.f32 %v1887_v15, %v1887_v15  ;;  %1629 = vset.pattern.permute.xlu0 %v1648_v58  ;;  %1630 = vset.pattern.permute.xlu1 %v1648_v58 }
 0x103   :  { %v560_v37 = vadd.f32 %v559_v31, %v526_v12  ;;  %v488_v23 = vadd.f32 %v487_v18, %v1892_v19  ;;  %v481_v44 = vadd.f32 %v480_v22, %v1875_v62  ;;  %v529_v47 = vmul.f32 %v1895_v24, %v1895_v24 }
 0x104   :  { %546 = vadd.xlane.f32.xlu1 %v545_v28  ;;  %v553_v45 = vadd.f32 %v552_v35, %v520_v11 }
 0x105   :  { %482 = vadd.xlane.f32.xlu0 %v481_v44  ;;  %v489_v46 = vadd.f32 %v488_v23, %v1887_v15  ;;  %v561_v48 = vadd.f32 %v560_v37, %v527_v25 }
 0x106   :  { %v554_v49 = vadd.f32 %v553_v45, %v521_v32 }
 0x107   :  { %v490_v53 = vadd.f32 %v489_v46, %v1895_v24  ;;  %v562_v31 = vadd.f32 %v561_v48, %v528_v43 }
 0x109   :  { %555 = vadd.xlane.f32.xlu0 %v554_v49  ;;  %491 = vadd.xlane.f32.xlu1 %v490_v53  ;;  %v563_v55 = vadd.f32 %v562_v31, %v529_v47 }
 0x10d   :  { %564 = vadd.xlane.f32.xlu1 %v563_v55  ;;  %v449_v55 = vld [vmem:[%s2335_s4] sm:$0xff] }
 0x18a   :  { %v465_v59 = vpop.xlane.xlu0 %464 }
 0x18b   :  { %v494_v61 = vmul.f32 0.0009765625, %v465_v59 }
 0x18d   :  { %v570_v63 = vmul.f32 %v494_v61, %v494_v61  ;;  %v538_v1 = vpop.xlane.xlu1 %537 }
 0x18e   :  { %v566_v4 = vmul.f32 0.0009765625, %v538_v1  ;;  %v474_v6 = vpop.xlane.xlu0 %473 }
 0x18f   :  { %v495_v8 = vmul.f32 0.0009765625, %v474_v6 }
 0x190   :  { %v574_v9 = vsub.f32 %v566_v4, %v570_v63  ;;  %v450_v4 = vld [vmem:[%s2335_s4 + $0x8] sm:$0xff] }
 0x191   :  { %v571_v11 = vmul.f32 %v495_v8, %v495_v8  ;;  %v547_v13 = vpop.xlane.xlu1 %546 }
 0x192   :  { %v578_v14 = vmax.f32 %v574_v9, 0.0  ;;  %v567_v18 = vmul.f32 0.0009765625, %v547_v13  ;;  %v483_v12 = vpop.xlane.xlu0 %482 }
 0x193   :  { %v496_v22 = vmul.f32 0.0009765625, %v483_v12 }
 0x194   :  { %v582_v25 = vadd.f32 1e-05, %v578_v14  ;;  %v575_v28 = vsub.f32 %v567_v18, %v571_v11  ;;  %v453_v14 = vld [vmem:[%s2336_s5] sm:$0xff] }
 0x195   :  { %v572_v23 = vmul.f32 %v496_v22, %v496_v22 }
 0x196   :  { %1631 = vrsqrt.f32 %v582_v25  ;;  %v579_v32 = vmax.f32 %v575_v28, 0.0  ;;  %v556_v35 = vpop.xlane.xlu0 %555  ;;  %v492_v37 = vpop.xlane.xlu1 %491  ;;  %v454_v25 = vld [vmem:[%s2336_s5 + $0x8] sm:$0xff] }
 0x197   :  { %v568_v43 = vmul.f32 0.0009765625, %v556_v35  ;;  %v497_v44 = vmul.f32 0.0009765625, %v492_v37  ;;  %v451_v35 = vld [vmem:[%s2335_s4 + $0x10] sm:$0xff] }
 0x198   :  { %v583_v45 = vadd.f32 1e-05, %v579_v32 }
 0x199   :  { %v576_v46 = vsub.f32 %v568_v43, %v572_v23  ;;  %v573_v48 = vmul.f32 %v497_v44, %v497_v44  ;;  %v452_v23 = vld [vmem:[%s2335_s4 + $0x18] sm:$0xff] }
 0x19a   :  { %1633 = vrsqrt.f32 %v583_v45  ;;  %v565_v47 = vpop.xlane.xlu1 %564  ;;  %v455_v45 = vld [vmem:[%s2336_s5 + $0x10] sm:$0xff] }
 0x19b   :  { %v569_v49 = vmul.f32 0.0009765625, %v565_v47  ;;  %v580_v53 = vmax.f32 %v576_v46, 0.0 }
 0x19d   :  { %v577_v31 = vsub.f32 %v569_v49, %v573_v48  ;;  %v584_v59 = vadd.f32 1e-05, %v580_v53  ;;  %v456_v48 = vld [vmem:[%s2336_s5 + $0x18] sm:$0xff] }
 0x19f   :  { %v581_v63 = vmax.f32 %v577_v31, 0.0  ;;  %1635 = vrsqrt.f32 %v584_v59 }
 0x1a0   :  { %v1632_v58 = vpop.eup %1631 }
 0x1a1   :  { %v590_v1 = vmul.f32 %v1632_v58, %v449_v55  ;;  %v585_v9 = vadd.f32 1e-05, %v581_v63 }
 0x1a3   :  { %604 = vperm.xlu0 %1629, %v590_v1   ;;  %v594_v13 = vmul.f32 %v590_v1, %v494_v61  ;;  %1637 = vrsqrt.f32 %v585_v9 }
 0x1a4   :  { %v1634_v6 = vpop.eup %1633 }
 0x1a5   :  { %v591_v11 = vmul.f32 %v1634_v6, %v450_v4  ;;  %v598_v18 = vsub.f32 %v453_v14, %v594_v13 }
 0x1a7   :  { %609 = vperm.xlu1 %1630, %v591_v11   ;;  %v595_v12 = vmul.f32 %v591_v11, %v495_v8 }
 0x1a9   :  { %v599_v28 = vsub.f32 %v454_v25, %v595_v12  ;;  %v1636_v32 = vpop.eup %1635 }
 0x1aa   :  { %v592_v61 = vmul.f32 %v1636_v32, %v451_v35 }
 0x1ab   :  { %656 = vperm.xlu1 %1630, %v598_v18  }
 0x1ac   :  { %v596_v43 = vmul.f32 %v592_v61, %v496_v22 }
 0x1ad   :  { %v1638_v37 = vpop.eup %1637 }
 0x1ae   :  { %v593_v8 = vmul.f32 %v1638_v37, %v452_v23  ;;  %v600_v46 = vsub.f32 %v455_v45, %v596_v43 }
 0x1af   :  { %661 = vperm.xlu1 %1630, %v599_v28  }
 0x1b0   :  { %v597_v47 = vmul.f32 %v593_v8, %v497_v44 }
 0x1b2   :  { %v601_v49 = vsub.f32 %v456_v48, %v597_v47 }
 0x1b3   :  { %614 = vperm.xlu1 %1630, %v592_v61  }
 0x1b7   :  { %619 = vperm.xlu1 %1630, %v593_v8  }
 0x1bb   :  { %666 = vperm.xlu1 %1630, %v600_v46  }
 0x1bf   :  { %671 = vperm.xlu1 %1630, %v601_v49  }
 0x222   :  { %v605_v53 = vpop.permute.xlu0 %604 }
 0x223   :  { %v623_v55 = vmul.f32 %v605_v53, %v1755_v29  ;;  %v625_v22 = vmul.f32 %v605_v53, %v1757_v30  ;;  %v622_v58 = vmul.f32 %v605_v53, %v1749_v26  ;;  %v624_v59 = vmul.f32 %v605_v53, %v1751_v27 }
 0x224   :  { %v627_v63 = vmul.f32 %v605_v53, %v1835_v20  ;;  %v629_v44 = vmul.f32 %v605_v53, %v1837_v21  ;;  %v626_v1 = vmul.f32 %v605_v53, %v1828_v16  ;;  %v628_v4 = vmul.f32 %v605_v53, %v1830_v17 }
 0x226   :  { %v610_v31 = vpop.permute.xlu1 %609 }
 0x227   :  { %v631_v6 = vmul.f32 %v610_v31, %v1774_v40  ;;  %v633_v9 = vmul.f32 %v610_v31, %v1778_v42  ;;  %v630_v29 = vmul.f32 %v610_v31, %v1766_v36  ;;  %v632_v30 = vmul.f32 %v610_v31, %v1770_v38 }
 0x228   :  { %v635_v26 = vmul.f32 %v610_v31, %v1852_v39  ;;  %v637_v27 = vmul.f32 %v610_v31, %v1854_v41  ;;  %v1948_v20 = vmul.f32 %v610_v31, %v1845_v33  ;;  %v1951_v16 = vmul.f32 %v610_v31, %v1847_v34 }
 0x22a   :  { %v657_v11 = vpop.permute.xlu1 %656 }
 0x22b   :  { %v675_v17 = vadd.f32 %v657_v11, %v623_v55  ;;  %v677_v21 = vadd.f32 %v657_v11, %v625_v22  ;;  %v674_v40 = vadd.f32 %v657_v11, %v622_v58  ;;  %v676_v13 = vadd.f32 %v657_v11, %v624_v59 }
 0x22c   :  { %v679_v42 = vadd.f32 %v657_v11, %v627_v63  ;;  %v1953_v14 = vadd.f32 %v657_v11, %v629_v44  ;;  %v1955_v36 = vadd.f32 %v657_v11, %v626_v1  ;;  %v1957_v38 = vadd.f32 %v657_v11, %v628_v4 }
 0x22d   :  { %vm707_vm1 = vcmp.ge.f32.partialorder %v675_v17, 0.0  ;;  %v739_v39 = vmul.f32 0.2, %v675_v17  ;;  %vm709_vm2 = vcmp.ge.f32.partialorder %v677_v21, 0.0  ;;  %v741_v41 = vmul.f32 0.2, %v677_v21 }
 0x22e   :  { %v662_v33 = vpop.permute.xlu1 %661  ;;  %vm706_vm3 = vcmp.ge.f32.partialorder %v674_v40, 0.0  ;;  %v738_v18 = vmul.f32 0.2, %v674_v40  ;;  %vm708_vm4 = vcmp.ge.f32.partialorder %v676_v13, 0.0  ;;  %v740_v34 = vmul.f32 0.2, %v676_v13 }
 0x22f   :  { %v683_v12 = vadd.f32 %v662_v33, %v631_v6  ;;  %v771_v25 = vsel %vm707_vm1, %v675_v17, %v739_v39  ;;  %v685_v28 = vadd.f32 %v662_v33, %v633_v9  ;;  %v773_v32 = vsel %vm709_vm2, %v677_v21, %v741_v41 }
 0x230   :  { %v682_v35 = vadd.f32 %v662_v33, %v630_v29  ;;  %v770_v61 = vsel %vm706_vm3, %v674_v40, %v738_v18  ;;  %v684_v37 = vadd.f32 %v662_v33, %v632_v30  ;;  %v772_v23 = vsel %vm708_vm4, %v676_v13, %v740_v34 }
 0x231   :  { %vm715_vm5 = vcmp.ge.f32.partialorder %v683_v12, 0.0  ;;  %v747_v8 = vmul.f32 0.2, %v683_v12  ;;  %vm717_vm6 = vcmp.ge.f32.partialorder %v685_v28, 0.0  ;;  %v749_v43 = vmul.f32 0.2, %v685_v28 }
 0x232   :  { %v1959_v45 = vpop.permute.xlu1 %614  ;;  %vm714_vm7 = vcmp.ge.f32.partialorder %v682_v35, 0.0  ;;  %v746_v46 = vmul.f32 0.2, %v682_v35  ;;  %vm716_vm8 = vcmp.ge.f32.partialorder %v684_v37, 0.0  ;;  %v748_v47 = vmul.f32 0.2, %v684_v37 }
 0x233   :  { %v779_v48 = vsel %vm715_vm5, %v683_v12, %v747_v8  ;;  %v781_v49 = vsel %vm717_vm6, %v685_v28, %v749_v43  ;;  %v639_v53 = vmul.f32 %v1959_v45, %v1794_v54  ;;  %v641_v31 = vmul.f32 %v1959_v45, %v1798_v56 }
 0x234   :  { %v1595_v55 = vpack.c.bf16 %v779_v48, %v771_v25  ;;  %v1603_v22 = vpack.c.bf16 %v781_v49, %v773_v32  ;;  %v778_v58 = vsel %vm714_vm7, %v682_v35, %v746_v46  ;;  %v780_v59 = vsel %vm716_vm8, %v684_v37, %v748_v47 }
 0x235   :  { %v1597_v63 = vpack.c.bf16 %v778_v58, %v770_v61  ;;  %v1605_v44 = vpack.c.bf16 %v780_v59, %v772_v23  ;;  %v638_v1 = vmul.f32 %v1959_v45, %v1786_v50  ;;  %v640_v4 = vmul.f32 %v1959_v45, %v1790_v52 }
 0x236   :  { %1596 = vmatprep.subr.bf16.mxu0 %v1595_v55  ;;  %1604 = vmatprep.subr.bf16.mxu1 %v1603_v22  ;;  %v1969_v6 = vpop.permute.xlu1 %619  ;;  %v687_v54 = vadd.f32 %v662_v33, %v635_v26  ;;  %vm711_vm9 = vcmp.ge.f32.partialorder %v679_v42, 0.0  ;;  %v743_v9 = vmul.f32 0.2, %v679_v42  ;;  %v689_v56 = vadd.f32 %v662_v33, %v637_v27 }
 0x237   :  { %1598 = vmatpush1.bf16.msra.mxu0 %v1597_v63  ;;  %1606 = vmatpush1.bf16.msra.mxu1 %v1605_v44  ;;  %v647_v29 = vmul.f32 %v1969_v6, %v1814_v5  ;;  %v649_v30 = vmul.f32 %v1969_v6, %v1818_v7  ;;  %v646_v50 = vmul.f32 %v1969_v6, %v1806_v0  ;;  %vm713_vm10 = vcmp.ge.f32.partialorder %v1953_v14, 0.0 }
 0x238   :  { %v648_v52 = vmul.f32 %v1969_v6, %v1810_v3  ;;  %vm719_vm11 = vcmp.ge.f32.partialorder %v687_v54, 0.0  ;;  %v751_v11 = vmul.f32 0.2, %v687_v54  ;;  %v1980_v26 = vsel %vm711_vm9, %v679_v42, %v743_v9 }
 0x239   :  { %vm721_vm12 = vcmp.ge.f32.partialorder %v689_v56, 0.0  ;;  %v745_v27 = vmul.f32 0.2, %v1953_v14  ;;  %v753_v17 = vmul.f32 0.2, %v689_v56  ;;  %v686_v5 = vadd.f32 %v662_v33, %v1948_v20 }
 0x23a   :  { %v1984_v21 = vpop.permute.xlu1 %666  ;;  %v1986_v7 = vsel %vm719_vm11, %v687_v54, %v751_v11  ;;  %vm710_vm13 = vcmp.ge.f32.partialorder %v1955_v36, 0.0  ;;  %v742_v0 = vmul.f32 0.2, %v1955_v36  ;;  %v1991_v3 = vadd.f32 %v662_v33, %v1951_v16 }
 0x23b   :  { %v691_v40 = vadd.f32 %v1984_v21, %v639_v53  ;;  %v693_v13 = vadd.f32 %v1984_v21, %v641_v31  ;;  %v690_v42 = vadd.f32 %v1984_v21, %v638_v1  ;;  %v692_v39 = vadd.f32 %v1984_v21, %v640_v4 }
 0x23c   :  { %v1611_v20 = vpack.c.bf16 %v1986_v7, %v1980_v26  ;;  %v777_v41 = vsel %vm713_vm10, %v1953_v14, %v745_v27  ;;  %v785_v18 = vsel %vm721_vm12, %v689_v56, %v753_v17  ;;  %vm718_vm14 = vcmp.ge.f32.partialorder %v686_v5, 0.0 }
 0x23d   :  { %vm723_vm15 = vcmp.ge.f32.partialorder %v691_v40, 0.0  ;;  %v755_v16 = vmul.f32 0.2, %v691_v40  ;;  %vm725_vm0 = vcmp.ge.f32.partialorder %v693_v13, 0.0  ;;  %v757_v33 = vmul.f32 0.2, %v693_v13 }
 0x23e   :  { %v2002_v34 = vpop.permute.xlu1 %671  ;;  %vm722_vm1 = vcmp.ge.f32.partialorder %v690_v42, 0.0  ;;  %v754_v12 = vmul.f32 0.2, %v690_v42  ;;  %vm724_vm2 = vcmp.ge.f32.partialorder %v692_v39, 0.0  ;;  %v756_v25 = vmul.f32 0.2, %v692_v39 }
 0x23f   :  { %v699_v28 = vadd.f32 %v2002_v34, %v647_v29  ;;  %v787_v32 = vsel %vm723_vm15, %v691_v40, %v755_v16  ;;  %v701_v35 = vadd.f32 %v2002_v34, %v649_v30  ;;  %v789_v61 = vsel %vm725_vm0, %v693_v13, %v757_v33  ;;  %v2018_v29 = vld [vmem:[%s2337_s3] sm:$0xff] }
 0x240   :  { %vm806_vm3 = vcmask 261120   ;;  %v698_v14 = vadd.f32 %v2002_v34, %v646_v50  ;;  %v786_v37 = vsel %vm722_vm1, %v690_v42, %v754_v12  ;;  %v700_v23 = vadd.f32 %v2002_v34, %v648_v52 }
 0x241   :  { %v788_v8 = vsel %vm724_vm2, %v692_v39, %v756_v25  ;;  %vm731_vm4 = vcmp.ge.f32.partialorder %v699_v28, 0.0  ;;  %v763_v43 = vmul.f32 0.2, %v699_v28  ;;  %vm733_vm5 = vcmp.ge.f32.partialorder %v701_v35, 0.0  ;;  %v804_v25 = vld [vmem:[%s2337_s3 + $0x10] sm:$0xff] }
 0x242   :  { %v765_v46 = vmul.f32 0.2, %v701_v35  ;;  %vm730_vm6 = vcmp.ge.f32.partialorder %v698_v14, 0.0  ;;  %v762_v47 = vmul.f32 0.2, %v698_v14  ;;  %vm732_vm7 = vcmp.ge.f32.partialorder %v700_v23, 0.0 }
 0x243   :  { %v764_v48 = vmul.f32 0.2, %v700_v23  ;;  %v795_v49 = vsel %vm731_vm4, %v699_v28, %v763_v43  ;;  %v1619_v31 = vpack.c.bf16 %v785_v18, %v777_v41  ;;  %v750_v55 = vmul.f32 0.2, %v686_v5 }
 0x244   :  { %v797_v53 = vsel %vm733_vm5, %v701_v35, %v765_v46  ;;  %v1599_v22 = vpack.c.bf16 %v795_v49, %v787_v32  ;;  %v794_v59 = vsel %vm730_vm6, %v698_v14, %v762_v47  ;;  %v774_v4 = vsel %vm710_vm13, %v1955_v36, %v742_v0 }
 0x245   :  { %v1607_v58 = vpack.c.bf16 %v797_v53, %v789_v61  ;;  %v796_v63 = vsel %vm732_vm7, %v700_v23, %v764_v48  ;;  %v1601_v44 = vpack.c.bf16 %v794_v59, %v786_v37  ;;  %v782_v54 = vsel %vm718_vm14, %v686_v5, %v750_v55 }
 0x246   :  { %v1609_v1 = vpack.c.bf16 %v796_v63, %v788_v8  ;;  %1600 = vmatprep.subr.bf16.mxu0 %v1599_v22  ;;  %v1613_v9 = vpack.c.bf16 %v782_v54, %v774_v4  ;;  %vm712_vm8 = vcmp.ge.f32.partialorder %v1957_v38, 0.0  ;;  %vm720_vm9 = vcmp.ge.f32.partialorder %v1991_v3, 0.0 }
 0x247   :  { %1608 = vmatprep.subr.bf16.mxu1 %v1607_v58  ;;  %v744_v56 = vmul.f32 0.2, %v1957_v38  ;;  %1602 = vmatpush1.bf16.msra.mxu0 %v1601_v44  ;;  %v752_v36 = vmul.f32 0.2, %v1991_v3  ;;  %v643_v30 = vmul.f32 %v1959_v45, %v1872_v60  ;;  %v651_v50 = vmul.f32 %v1969_v6, %v1892_v19 }
 0x248   :  { %1610 = vmatpush1.bf16.msra.mxu1 %v1609_v1  ;;  %v645_v52 = vmul.f32 %v1959_v45, %v1875_v62  ;;  %1612 = vmatprep.subr.bf16.mxu0 %v1611_v20  ;;  %v653_v26 = vmul.f32 %v1969_v6, %v1895_v24  ;;  %v642_v27 = vmul.f32 %v1959_v45, %v1863_v51  ;;  %v2044_v51 = vld [vmem:[%s2337_s3 + $0x8] sm:$0xff] }
 0x249   :  { %1620 = vmatprep.subr.bf16.mxu1 %v1619_v31  ;;  %v776_v11 = vsel %vm712_vm8, %v1957_v38, %v744_v56  ;;  %v784_v17 = vsel %vm720_vm9, %v1991_v3, %v752_v36  ;;  %v695_v60 = vadd.f32 %v1984_v21, %v643_v30  ;;  %v703_v5 = vadd.f32 %v2002_v34, %v651_v50 }
 0x24a   :  { %v697_v19 = vadd.f32 %v1984_v21, %v645_v52  ;;  %1579 = vmatmul.mubr.msk.f32.vlgmr.msra.gmra.mrb[16].mxu0 %vm806_vm3, %v2018_v29  ;;  %v1621_v62 = vpack.c.bf16 %v784_v17, %v776_v11  ;;  %v705_v24 = vadd.f32 %v2002_v34, %v653_v26  ;;  %v650_v38 = vmul.f32 %v1969_v6, %v1881_v10 }
 0x24b   :  { %1583 = vmatmul.mubr.msk.f32.vlgmr.msra.gmra.mrb[16].mxu1 %vm806_vm3, %v2018_v29  ;;  %1614 = vmatpush1.bf16.msra.mxu0 %v1613_v9  ;;  %vm727_vm10 = vcmp.ge.f32.partialorder %v695_v60, 0.0  ;;  %vm735_vm11 = vcmp.ge.f32.partialorder %v703_v5, 0.0  ;;  %v759_v7 = vmul.f32 0.2, %v695_v60  ;;  %v767_v0 = vmul.f32 0.2, %v703_v5 }
 0x24c   :  { %889 = vmatprep.mubr.f32.mxu0 %v1647_v2  ;;  %1622 = vmatpush1.bf16.msra.mxu1 %v1621_v62  ;;  %vm729_vm12 = vcmp.ge.f32.partialorder %v697_v19, 0.0  ;;  %vm737_vm13 = vcmp.ge.f32.partialorder %v705_v24, 0.0  ;;  %v761_v3 = vmul.f32 0.2, %v697_v19  ;;  %v769_v40 = vmul.f32 0.2, %v705_v24 }
 0x24d   :  { %978 = vmatprep.mubr.f32.mxu1 %v1647_v2  ;;  %v791_v13 = vsel %vm727_vm10, %v695_v60, %v759_v7  ;;  %v799_v42 = vsel %vm735_vm11, %v703_v5, %v767_v0  ;;  %v694_v39 = vadd.f32 %v1984_v21, %v642_v27  ;;  %v702_v10 = vadd.f32 %v2002_v34, %v650_v38 }
 0x24e   :  { %v1615_v20 = vpack.c.bf16 %v799_v42, %v791_v13  ;;  %v793_v41 = vsel %vm729_vm12, %v697_v19, %v761_v3  ;;  %v801_v18 = vsel %vm737_vm13, %v705_v24, %v769_v40  ;;  %1580 = vmatmul.mubr.msk.f32.gmra.mrb[18].mxu0 %vm806_vm3, %v2044_v51  ;;  %v644_v16 = vmul.f32 %v1959_v45, %v1867_v57 }
 0x24f   :  { %v1623_v33 = vpack.c.bf16 %v801_v18, %v793_v41  ;;  %vm726_vm14 = vcmp.ge.f32.partialorder %v694_v39, 0.0  ;;  %vm734_vm15 = vcmp.ge.f32.partialorder %v702_v10, 0.0  ;;  %v758_v12 = vmul.f32 0.2, %v694_v39  ;;  %895 = vmatprep.mubr.f32.mxu0 %v1647_v2  ;;  %1584 = vmatmul.mubr.msk.f32.gmra.mrb[18].mxu1 %vm806_vm3, %v2044_v51 }
 0x250   :  { %1616 = vmatprep.subr.bf16.mxu0 %v1615_v20  ;;  %v766_v28 = vmul.f32 0.2, %v702_v10  ;;  %v652_v32 = vmul.f32 %v1969_v6, %v1887_v15  ;;  %v696_v57 = vadd.f32 %v1984_v21, %v644_v16  ;;  %984 = vmatprep.mubr.f32.mxu1 %v1647_v2  ;;  %v805_v15 = vld [vmem:[%s2337_s3 + $0x18] sm:$0xff] }
 0x251   :  { %1624 = vmatprep.subr.bf16.mxu1 %v1623_v33  ;;  %v790_v45 = vsel %vm726_vm14, %v694_v39, %v758_v12 }
 0x252   :  { %v798_v35 = vsel %vm734_vm15, %v702_v10, %v766_v28  ;;  %v704_v61 = vadd.f32 %v2002_v34, %v652_v32  ;;  %v760_v14 = vmul.f32 0.2, %v696_v57  ;;  %1581 = vmatmul.mubr.msk.f32.gmra.mrb[20].mxu0 %vm806_vm3, %v804_v25  ;;  %vm728_vm0 = vcmp.ge.f32.partialorder %v696_v57, 0.0 }
 0x253   :  { %v1617_v37 = vpack.c.bf16 %v798_v35, %v790_v45  ;;  %901 = vmatprep.mubr.f32.mxu0 %v1647_v2  ;;  %1585 = vmatmul.mubr.msk.f32.gmra.mrb[20].mxu1 %vm806_vm3, %v804_v25 }
 0x254   :  { %vm736_vm1 = vcmp.ge.f32.partialorder %v704_v61, 0.0  ;;  %v768_v6 = vmul.f32 0.2, %v704_v61  ;;  %990 = vmatprep.mubr.f32.mxu1 %v1647_v2  ;;  %v792_v21 = vsel %vm728_vm0, %v696_v57, %v760_v14 }
 0x255   :  { %1618 = vmatpush1.bf16.msra.mxu0 %v1617_v37 }
 0x256   :  { %v800_v34 = vsel %vm736_vm1, %v704_v61, %v768_v6  ;;  %1582 = vmatmul.mubr.msk.f32.gmra.mrb[22].mxu0 %vm806_vm3, %v805_v15 }
 0x257   :  { %v1625_v23 = vpack.c.bf16 %v800_v34, %v792_v21  ;;  %1061 = vmatprep.mubr.f32.mxu0 %v1647_v2  ;;  %1586 = vmatmul.mubr.msk.f32.gmra.mrb[22].mxu1 %vm806_vm3, %v805_v15 }
 0x258   :  { %1150 = vmatprep.mubr.f32.mxu1 %v1647_v2 }
 0x259   :  { %1626 = vmatpush1.bf16.msra.mxu1 %v1625_v23 }
 0x25a   :  { %1587 = vmatmul.mubr.msk.f32.vlgmr.msra.gmra.mrb[24].mxu0 %vm806_vm3, %v2018_v29 }
 0x25b   :  { %1067 = vmatprep.mubr.f32.mxu0 %v1647_v2 }
 0x25c   :  { %1591 = vmatmul.mubr.msk.f32.vlgmr.msra.gmra.mrb[24].mxu1 %vm806_vm3, %v2018_v29 }
 0x25d   :  { %1156 = vmatprep.mubr.f32.mxu1 %v1647_v2 }
 0x25e   :  { %1588 = vmatmul.mubr.msk.f32.gmra.mrb[26].mxu0 %vm806_vm3, %v2044_v51 }
 0x25f   :  { %1073 = vmatprep.mubr.f32.mxu0 %v1647_v2 }
 0x260   :  { %1592 = vmatmul.mubr.msk.f32.gmra.mrb[26].mxu1 %vm806_vm3, %v2044_v51 }
 0x261   :  { %1162 = vmatprep.mubr.f32.mxu1 %v1647_v2 }
 0x262   :  { %1589 = vmatmul.mubr.msk.f32.gmra.mrb[28].mxu0 %vm806_vm3, %v804_v25 }
 0x263   :  { %1079 = vmatprep.mubr.f32.mxu0 %v1647_v2 }
 0x264   :  { %1593 = vmatmul.mubr.msk.f32.gmra.mrb[28].mxu1 %vm806_vm3, %v804_v25 }
 0x265   :  { %1168 = vmatprep.mubr.f32.mxu1 %v1647_v2 }
 0x266   :  { %1590 = vmatmul.mubr.msk.f32.gmra.mrb[30].mxu0 %vm806_vm3, %v805_v15 }
 0x268   :  { %1594 = vmatmul.mubr.msk.f32.gmra.mrb[30].mxu1 %vm806_vm3, %v805_v15 }
 0x31d   :  { %v2096_v8 = vpop.f32.mrb[16].mxu0 }
 0x31e   :  { %v2098_v43 = vpop.f32.mrb[16].mxu1  ;;  %v1223_v46 = vmul.f32 %v2096_v8, %v2096_v8  ;;  %v2102_v47 = vpop.f32.mrb[17].mxu0 }
 0x31f   :  { %v2104_v48 = vpop.f32.mrb[17].mxu1  ;;  %v1183_v49 = vadd.f32 %v2102_v47, %v2096_v8  ;;  %v1224_v2 = vmul.f32 %v2102_v47, %v2102_v47  ;;  %v1225_v53 = vmul.f32 %v2098_v43, %v2098_v43 }
 0x320   :  { %v1226_v58 = vmul.f32 %v2104_v48, %v2104_v48 }
 0x321   :  { %v1255_v31 = vadd.f32 %v1224_v2, %v1223_v46  ;;  %v1184_v55 = vadd.f32 %v1183_v49, %v2098_v43  ;;  %v2113_v22 = vpop.f32.mrb[18].mxu0 }
 0x322   :  { %v1231_v59 = vmul.f32 %v2113_v22, %v2113_v22  ;;  %v2119_v63 = vpop.f32.mrb[19].mxu0  ;;  %v2121_v44 = vpop.f32.mrb[18].mxu1 }
 0x323   :  { %v1256_v1 = vadd.f32 %v1255_v31, %v1225_v53  ;;  %v1192_v4 = vadd.f32 %v2119_v63, %v2113_v22  ;;  %v1232_v54 = vmul.f32 %v2119_v63, %v2119_v63  ;;  %v1185_v9 = vadd.f32 %v1184_v55, %v2104_v48  ;;  %v2128_v56 = vpop.f32.mrb[19].mxu1 }
 0x324   :  { %v1233_v29 = vmul.f32 %v2121_v44, %v2121_v44  ;;  %v1234_v11 = vmul.f32 %v2128_v56, %v2128_v56 }
 0x325   :  { %v1264_v36 = vadd.f32 %v1232_v54, %v1231_v59  ;;  %v1257_v30 = vadd.f32 %v1256_v1, %v1226_v58  ;;  %v1193_v50 = vadd.f32 %v1192_v4, %v2121_v44  ;;  %v2133_v52 = vpop.f32.mrb[20].mxu0 }
 0x326   :  { %v1239_v26 = vmul.f32 %v2133_v52, %v2133_v52  ;;  %v2139_v27 = vpop.f32.mrb[21].mxu0  ;;  %v2141_v17 = vpop.f32.mrb[20].mxu1 }
 0x327   :  { %v1265_v60 = vadd.f32 %v1264_v36, %v1233_v29  ;;  %v1201_v5 = vadd.f32 %v2139_v27, %v2133_v52  ;;  %v1240_v19 = vmul.f32 %v2139_v27, %v2139_v27  ;;  %v1194_v62 = vadd.f32 %v1193_v50, %v2128_v56  ;;  %v2148_v24 = vpop.f32.mrb[21].mxu1 }
 0x328   :  { %v1241_v51 = vmul.f32 %v2141_v17, %v2141_v17  ;;  %v1242_v40 = vmul.f32 %v2148_v24, %v2148_v24 }
 0x329   :  { %v1273_v38 = vadd.f32 %v1240_v19, %v1239_v26  ;;  %v1266_v7 = vadd.f32 %v1265_v60, %v1234_v11  ;;  %v2152_v0 = vpop.f32.mrb[22].mxu0  ;;  %v1202_v3 = vadd.f32 %v1201_v5, %v2141_v17 }
 0x32a   :  { %v1247_v13 = vmul.f32 %v2152_v0, %v2152_v0  ;;  %v2159_v42 = vpop.f32.mrb[23].mxu0  ;;  %v2161_v39 = vpop.f32.mrb[22].mxu1 }
 0x32b   :  { %v1210_v10 = vadd.f32 %v2159_v42, %v2152_v0  ;;  %v1248_v20 = vmul.f32 %v2159_v42, %v2159_v42  ;;  %v1274_v41 = vadd.f32 %v1273_v38, %v1241_v51  ;;  %v1203_v18 = vadd.f32 %v1202_v3, %v2148_v24  ;;  %v2168_v16 = vpop.f32.mrb[23].mxu1 }
 0x32c   :  { %v1249_v33 = vmul.f32 %v2161_v39, %v2161_v39  ;;  %v1250_v57 = vmul.f32 %v2168_v16, %v2168_v16 }
 0x32d   :  { %v1282_v12 = vadd.f32 %v1248_v20, %v1247_v13  ;;  %v2172_v25 = vpop.f32.mrb[24].mxu0  ;;  %v1275_v28 = vadd.f32 %v1274_v41, %v1242_v40  ;;  %v1211_v32 = vadd.f32 %v1210_v10, %v2161_v39 }
 0x32e   :  { %v1186_v45 = vadd.f32 %v1185_v9, %v2172_v25  ;;  %v1227_v35 = vmul.f32 %v2172_v25, %v2172_v25  ;;  %v2180_v61 = vpop.f32.mrb[25].mxu0 }
 0x32f   :  { %v1283_v14 = vadd.f32 %v1282_v12, %v1249_v33  ;;  %v1228_v37 = vmul.f32 %v2180_v61, %v2180_v61  ;;  %v1212_v15 = vadd.f32 %v1211_v32, %v2168_v16  ;;  %v2185_v6 = vpop.f32.mrb[24].mxu1 }
 0x330   :  { %v1258_v21 = vadd.f32 %v1257_v30, %v1227_v35  ;;  %v1187_v34 = vadd.f32 %v1186_v45, %v2180_v61  ;;  %v2188_v23 = vpop.f32.mrb[25].mxu1  ;;  %v1229_v2 = vmul.f32 %v2185_v6, %v2185_v6 }
 0x331   :  { %v1284_v46 = vadd.f32 %v1283_v14, %v1250_v57  ;;  %v2190_v49 = vpop.f32.mrb[26].mxu0  ;;  %v1230_v11 = vmul.f32 %v2188_v23, %v2188_v23 }
 0x332   :  { %v1195_v53 = vadd.f32 %v1194_v62, %v2190_v49  ;;  %v1235_v31 = vmul.f32 %v2190_v49, %v2190_v49  ;;  %v2197_v55 = vpop.f32.mrb[27].mxu0  ;;  %v1188_v58 = vadd.f32 %v1187_v34, %v2185_v6  ;;  %v1259_v59 = vadd.f32 %v1258_v21, %v1228_v37 }
 0x333   :  { %v1236_v1 = vmul.f32 %v2197_v55, %v2197_v55  ;;  %v2202_v4 = vpop.f32.mrb[26].mxu1 }
 0x334   :  { %v1267_v54 = vadd.f32 %v1266_v7, %v1235_v31  ;;  %v1196_v9 = vadd.f32 %v1195_v53, %v2197_v55  ;;  %v1237_v29 = vmul.f32 %v2202_v4, %v2202_v4  ;;  %v1189_v36 = vadd.f32 %v1188_v58, %v2188_v23  ;;  %v2208_v30 = vpop.f32.mrb[27].mxu1 }
 0x335   :  { %v2210_v50 = vpop.f32.mrb[28].mxu0  ;;  %v1260_v26 = vadd.f32 %v1259_v59, %v1229_v2  ;;  %v1238_v20 = vmul.f32 %v2208_v30, %v2208_v30 }
 0x336   :  { %v1204_v60 = vadd.f32 %v1203_v18, %v2210_v50  ;;  %v1243_v5 = vmul.f32 %v2210_v50, %v2210_v50  ;;  %1190 = vadd.xlane.f32.xlu1 %v1189_v36  ;;  %v2217_v19 = vpop.f32.mrb[29].mxu0  ;;  %v1268_v62 = vadd.f32 %v1267_v54, %v1236_v1  ;;  %v1197_v51 = vadd.f32 %v1196_v9, %v2202_v4 }
 0x337   :  { %v1244_v38 = vmul.f32 %v2217_v19, %v2217_v19  ;;  %v1261_v7 = vadd.f32 %v1260_v26, %v1230_v11  ;;  %v2222_v3 = vpop.f32.mrb[28].mxu1 }
 0x338   :  { %v1276_v40 = vadd.f32 %v1275_v28, %v1243_v5  ;;  %v1205_v13 = vadd.f32 %v1204_v60, %v2217_v19  ;;  %v2225_v10 = vpop.f32.mrb[29].mxu1  ;;  %v1269_v41 = vadd.f32 %v1268_v62, %v1237_v29  ;;  %v1245_v33 = vmul.f32 %v2222_v3, %v2222_v3 }
 0x339   :  { %1262 = vadd.xlane.f32.xlu0 %v1261_v7  ;;  %v2229_v18 = vpop.f32.mrb[30].mxu0  ;;  %v1198_v12 = vadd.f32 %v1197_v51, %v2208_v30  ;;  %v1246_v58 = vmul.f32 %v2225_v10, %v2225_v10 }
 0x33a   :  { %v1213_v32 = vadd.f32 %v1212_v15, %v2229_v18  ;;  %v1251_v28 = vmul.f32 %v2229_v18, %v2229_v18  ;;  %v2237_v57 = vpop.f32.mrb[31].mxu0  ;;  %v1270_v45 = vadd.f32 %v1269_v41, %v1238_v20  ;;  %v1206_v35 = vadd.f32 %v1205_v13, %v2222_v3 }
 0x33b   :  { %v1252_v14 = vmul.f32 %v2237_v57, %v2237_v57  ;;  %v2242_v37 = vpop.f32.mrb[30].mxu1  ;;  %v1277_v21 = vadd.f32 %v1276_v40, %v1244_v38 }
 0x33c   :  { %v1285_v34 = vadd.f32 %v1284_v46, %v1251_v28  ;;  %v1214_v2 = vadd.f32 %v1213_v32, %v2237_v57  ;;  %1271 = vadd.xlane.f32.xlu1 %v1270_v45  ;;  %v1253_v15 = vmul.f32 %v2242_v37, %v2242_v37  ;;  %v2247_v53 = vpop.f32.mrb[31].mxu1  ;;  %v1207_v31 = vadd.f32 %v1206_v35, %v2225_v10 }
 0x33d   :  { %1199 = vadd.xlane.f32.xlu0 %v1198_v12  ;;  %v1278_v59 = vadd.f32 %v1277_v21, %v1245_v33  ;;  %v1254_v46 = vmul.f32 %v2247_v53, %v2247_v53 }
 0x33e   :  { %v1286_v1 = vadd.f32 %v1285_v34, %v1252_v14  ;;  %v1215_v54 = vadd.f32 %v1214_v2, %v2242_v37 }
 0x33f   :  { %v1279_v9 = vadd.f32 %v1278_v59, %v1246_v58 }
 0x340   :  { %v1216_v29 = vadd.f32 %v1215_v54, %v2247_v53  ;;  %v1287_v36 = vadd.f32 %v1286_v1, %v1253_v15 }
 0x341   :  { %1208 = vadd.xlane.f32.xlu0 %v1207_v31 }
 0x342   :  { %1217 = vadd.xlane.f32.xlu1 %v1216_v29  ;;  %v1288_v11 = vadd.f32 %v1287_v36, %v1254_v46  ;;  %v1175_v29 = vld [vmem:[%s2338_s6] sm:$0xff] }
 0x345   :  { %1280 = vadd.xlane.f32.xlu0 %v1279_v9 }
 0x346   :  { %1289 = vadd.xlane.f32.xlu1 %v1288_v11 }
 0x3c3   :  { %v1191_v26 = vpop.xlane.xlu1 %1190 }
 0x3c4   :  { %v1219_v60 = vmul.f32 0.0009765625, %v1191_v26 }
 0x3c6   :  { %v1295_v5 = vmul.f32 %v1219_v60, %v1219_v60  ;;  %v1263_v62 = vpop.xlane.xlu0 %1262 }
 0x3c7   :  { %v1291_v51 = vmul.f32 0.0009765625, %v1263_v62 }
 0x3c9   :  { %v1299_v38 = vsub.f32 %v1291_v51, %v1295_v5  ;;  %v1272_v7 = vpop.xlane.xlu1 %1271  ;;  %v1176_v51 = vld [vmem:[%s2338_s6 + $0x8] sm:$0xff] }
 0x3ca   :  { %v1200_v40 = vpop.xlane.xlu0 %1199  ;;  %v1292_v33 = vmul.f32 0.0009765625, %v1272_v7 }
 0x3cb   :  { %v1303_v13 = vmax.f32 %v1299_v38, 0.0  ;;  %v1220_v20 = vmul.f32 0.0009765625, %v1200_v40 }
 0x3cd   :  { %v1307_v41 = vadd.f32 1e-05, %v1303_v13  ;;  %v1296_v12 = vmul.f32 %v1220_v20, %v1220_v20  ;;  %v1180_v13 = vld [vmem:[%s2339_s7 + $0x8] sm:$0xff] }
 0x3ce   :  { %v1209_v32 = vpop.xlane.xlu0 %1208 }
 0x3cf   :  { %1639 = vrsqrt.f32 %v1307_v41  ;;  %v1300_v28 = vsub.f32 %v1292_v33, %v1296_v12  ;;  %v1221_v45 = vmul.f32 0.0009765625, %v1209_v32  ;;  %v1218_v35 = vpop.xlane.xlu1 %1217  ;;  %v1179_v41 = vld [vmem:[%s2339_s7] sm:$0xff]  ;;  %v1177_v12 = vld [vmem:[%s2338_s6 + $0x10] sm:$0xff] }
 0x3d0   :  { %v1222_v14 = vmul.f32 0.0009765625, %v1218_v35 }
 0x3d1   :  { %v1304_v21 = vmax.f32 %v1300_v28, 0.0  ;;  %v1297_v15 = vmul.f32 %v1221_v45, %v1221_v45 }
 0x3d2   :  { %v1281_v34 = vpop.xlane.xlu0 %1280  ;;  %v1298_v59 = vmul.f32 %v1222_v14, %v1222_v14 }
 0x3d3   :  { %v1308_v2 = vadd.f32 1e-05, %v1304_v21  ;;  %v1293_v31 = vmul.f32 0.0009765625, %v1281_v34  ;;  %v1290_v58 = vpop.xlane.xlu1 %1289 }
 0x3d4   :  { %v1294_v1 = vmul.f32 0.0009765625, %v1290_v58 }
 0x3d5   :  { %1641 = vrsqrt.f32 %v1308_v2  ;;  %v1301_v54 = vsub.f32 %v1293_v31, %v1297_v15  ;;  %v1181_v31 = vld [vmem:[%s2339_s7 + $0x10] sm:$0xff] }
 0x3d6   :  { %v1302_v9 = vsub.f32 %v1294_v1, %v1298_v59 }
 0x3d7   :  { %v1305_v46 = vmax.f32 %v1301_v54, 0.0 }
 0x3d8   :  { %v1306_v36 = vmax.f32 %v1302_v9, 0.0 }
 0x3d9   :  { %v1640_v11 = vpop.eup %1639  ;;  %v1309_v26 = vadd.f32 1e-05, %v1305_v46 }
 0x3da   :  { %v1310_v5 = vadd.f32 1e-05, %v1306_v36  ;;  %v1315_v62 = vmul.f32 %v1640_v11, %v1175_v29 }
 0x3db   :  { %1643 = vrsqrt.f32 %v1309_v26 }
 0x3dc   :  { %1645 = vrsqrt.f32 %v1310_v5  ;;  %1329 = vperm.xlu0 %1629, %v1315_v62   ;;  %v1319_v40 = vmul.f32 %v1315_v62, %v1219_v60  ;;  %v1178_v60 = vld [vmem:[%s2338_s6 + $0x18] sm:$0xff] }
 0x3de   :  { %v1323_v28 = vsub.f32 %v1179_v41, %v1319_v40 }
 0x3df   :  { %v1642_v38 = vpop.eup %1641 }
 0x3e0   :  { %v1316_v7 = vmul.f32 %v1642_v38, %v1176_v51 }
 0x3e2   :  { %v1320_v33 = vmul.f32 %v1316_v7, %v1220_v20  ;;  %1334 = vperm.xlu1 %1630, %v1316_v7   ;;  %v1182_v20 = vld [vmem:[%s2339_s7 + $0x18] sm:$0xff] }
 0x3e4   :  { %v1324_v32 = vsub.f32 %v1180_v13, %v1320_v33 }
 0x3e5   :  { %v1644_v35 = vpop.eup %1643 }
 0x3e6   :  { %v1646_v21 = vpop.eup %1645  ;;  %1358 = vperm.xlu0 %1629, %v1324_v32   ;;  %1353 = vperm.xlu1 %1630, %v1323_v28   ;;  %v1317_v34 = vmul.f32 %v1644_v35, %v1177_v12 }
 0x3e7   :  { %v1318_v2 = vmul.f32 %v1646_v21, %v1178_v60 }
 0x3e8   :  { %v1321_v15 = vmul.f32 %v1317_v34, %v1221_v45 }
 0x3e9   :  { %v1322_v58 = vmul.f32 %v1318_v2, %v1222_v14 }
 0x3ea   :  { %1339 = vperm.xlu1 %1630, %v1317_v34   ;;  %1344 = vperm.xlu0 %1629, %v1318_v2   ;;  %v1325_v1 = vsub.f32 %v1181_v31, %v1321_v15 }
 0x3eb   :  { %v1326_v59 = vsub.f32 %v1182_v20, %v1322_v58 }
 0x3ee   :  { %1363 = vperm.xlu1 %1630, %v1325_v1   ;;  %1368 = vperm.xlu0 %1629, %v1326_v59  }
 0x45b   :  { %v1330_v54 = vpop.permute.xlu0 %1329 }
 0x45c   :  { %v1347_v46 = vmul.f32 %v1330_v54, %v2096_v8  ;;  %v1387_v45 = vmul.f32 %v1330_v54, %v2102_v47  ;;  %v1411_v29 = vmul.f32 %v1330_v54, %v2098_v43  ;;  %v1435_v36 = vmul.f32 %v1330_v54, %v2104_v48 }
 0x45d   :  { %v1459_v11 = vmul.f32 %v1330_v54, %v2172_v25  ;;  %v2286_v14 = vmul.f32 %v1330_v54, %v2180_v61  ;;  %v2289_v26 = vmul.f32 %v1330_v54, %v2185_v6  ;;  %v1531_v32 = vmul.f32 %v1330_v54, %v2188_v23 }
 0x461   :  { %v1335_v9 = vpop.permute.xlu1 %1334 }
 0x462   :  { %v1348_v5 = vmul.f32 %v1335_v9, %v2113_v22  ;;  %v1388_v62 = vmul.f32 %v1335_v9, %v2119_v63  ;;  %v1412_v8 = vmul.f32 %v1335_v9, %v2121_v44  ;;  %v1436_v47 = vmul.f32 %v1335_v9, %v2128_v56 }
 0x463   :  { %v1460_v43 = vmul.f32 %v1335_v9, %v2190_v49  ;;  %v1484_v48 = vmul.f32 %v1335_v9, %v2197_v55  ;;  %v1508_v25 = vmul.f32 %v1335_v9, %v2202_v4  ;;  %v1532_v61 = vmul.f32 %v1335_v9, %v2208_v30 }
 0x465   :  { %v1359_v51 = vpop.permute.xlu0 %1358  ;;  %v1354_v12 = vpop.permute.xlu1 %1353 }
 0x466   :  { %v1372_v38 = vadd.f32 %v1359_v51, %v1348_v5  ;;  %v1392_v6 = vadd.f32 %v1388_v62, %v1359_v51  ;;  %v1416_v7 = vadd.f32 %v1412_v8, %v1359_v51  ;;  %v1440_v40 = vadd.f32 %v1436_v47, %v1359_v51 }
 0x467   :  { %v1464_v22 = vadd.f32 %v1460_v43, %v1359_v51  ;;  %v1488_v13 = vadd.f32 %v1484_v48, %v1359_v51  ;;  %v1512_v63 = vadd.f32 %v1508_v25, %v1359_v51  ;;  %v1536_v41 = vadd.f32 %v1532_v61, %v1359_v51 }
 0x468   :  { %vm1376_vm2 = vcmp.ge.f32.partialorder %v1372_v38, 0.0  ;;  %v1380_v44 = vmul.f32 0.2, %v1372_v38  ;;  %vm1396_vm3 = vcmp.ge.f32.partialorder %v1392_v6, 0.0  ;;  %v1400_v56 = vmul.f32 0.2, %v1392_v6 }
 0x469   :  { %vm1420_vm4 = vcmp.ge.f32.partialorder %v1416_v7, 0.0  ;;  %v1424_v49 = vmul.f32 0.2, %v1416_v7  ;;  %vm1444_vm5 = vcmp.ge.f32.partialorder %v1440_v40, 0.0  ;;  %v1448_v55 = vmul.f32 0.2, %v1440_v40  ;;  %v1345_v25 = vpop.permute.xlu0 %1344 }
 0x46a   :  { %v1384_v4 = vsel %vm1376_vm2, %v1372_v38, %v1380_v44  ;;  %v1404_v33 = vsel %vm1396_vm3, %v1392_v6, %v1400_v56  ;;  %vm1468_vm6 = vcmp.ge.f32.partialorder %v1464_v22, 0.0  ;;  %v1472_v30 = vmul.f32 0.2, %v1464_v22 }
 0x46b   :  { %v1408_v28 = vmax.f32 %v1384_v4, %v1404_v33  ;;  %v1428_v60 = vsel %vm1420_vm4, %v1416_v7, %v1424_v49  ;;  %vm1492_vm7 = vcmp.ge.f32.partialorder %v1488_v13, 0.0  ;;  %v1452_v35 = vsel %vm1444_vm5, %v1440_v40, %v1448_v55 }
 0x46c   :  { %v1496_v21 = vmul.f32 0.2, %v1488_v13  ;;  %vm1516_vm8 = vcmp.ge.f32.partialorder %v1512_v63, 0.0  ;;  %v1520_v34 = vmul.f32 0.2, %v1512_v63  ;;  %v1476_v15 = vsel %vm1468_vm6, %v1464_v22, %v1472_v30 }
 0x46d   :  { %v1432_v2 = vmax.f32 %v1408_v28, %v1428_v60  ;;  %vm1540_vm9 = vcmp.ge.f32.partialorder %v1536_v41, 0.0  ;;  %v1371_v20 = vadd.f32 %v1354_v12, %v1347_v46  ;;  %v1544_v58 = vmul.f32 0.2, %v1536_v41  ;;  %v1369_v55 = vpop.permute.xlu0 %1368 }
 0x46e   :  { %v1500_v31 = vsel %vm1492_vm7, %v1488_v13, %v1496_v21  ;;  %v1391_v59 = vadd.f32 %v1387_v45, %v1354_v12  ;;  %v1415_v1 = vadd.f32 %v1411_v29, %v1354_v12  ;;  %v1524_v5 = vsel %vm1516_vm8, %v1512_v63, %v1520_v34 }
 0x46f   :  { %v1456_v9 = vmax.f32 %v1432_v2, %v1452_v35  ;;  %vm1375_vm10 = vcmp.ge.f32.partialorder %v1371_v20, 0.0  ;;  %v1379_v62 = vmul.f32 0.2, %v1371_v20  ;;  %v1439_v43 = vadd.f32 %v1435_v36, %v1354_v12 }
 0x470   :  { %vm1395_vm11 = vcmp.ge.f32.partialorder %v1391_v59, 0.0  ;;  %v1399_v23 = vmul.f32 0.2, %v1391_v59  ;;  %vm1419_vm12 = vcmp.ge.f32.partialorder %v1415_v1, 0.0  ;;  %v1423_v54 = vmul.f32 0.2, %v1415_v1 }
 0x471   :  { %v1480_v8 = vmax.f32 %v1456_v9, %v1476_v15  ;;  %v1383_v47 = vsel %vm1375_vm10, %v1371_v20, %v1379_v62  ;;  %v1463_v48 = vadd.f32 %v1459_v11, %v1354_v12  ;;  %v1487_v46 = vadd.f32 %v2286_v14, %v1354_v12 }
 0x472   :  { %v1403_v61 = vsel %vm1395_vm11, %v1391_v59, %v1399_v23  ;;  %v1427_v51 = vsel %vm1419_vm12, %v1415_v1, %v1423_v54  ;;  %v1511_v45 = vadd.f32 %v2289_v26, %v1354_v12  ;;  %vm1443_vm13 = vcmp.ge.f32.partialorder %v1439_v43, 0.0 }
 0x473   :  { %v1504_v29 = vmax.f32 %v1480_v8, %v1500_v31  ;;  %v1407_v38 = vmax.f32 %v1383_v47, %v1403_v61  ;;  %v1447_v6 = vmul.f32 0.2, %v1439_v43  ;;  %vm1467_vm14 = vcmp.ge.f32.partialorder %v1463_v48, 0.0 }
 0x474   :  { %v1471_v7 = vmul.f32 0.2, %v1463_v48  ;;  %vm1491_vm15 = vcmp.ge.f32.partialorder %v1487_v46, 0.0  ;;  %v1495_v40 = vmul.f32 0.2, %v1487_v46  ;;  %v1548_v13 = vsel %vm1540_vm9, %v1536_v41, %v1544_v58  ;;  %v1340_v58 = vpop.permute.xlu1 %1339 }
 0x475   :  { %v1528_v22 = vmax.f32 %v1504_v29, %v1524_v5  ;;  %v1431_v36 = vmax.f32 %v1407_v38, %v1427_v51  ;;  %v1451_v11 = vsel %vm1443_vm13, %v1439_v43, %v1447_v6  ;;  %vm1515_vm0 = vcmp.ge.f32.partialorder %v1511_v45, 0.0 }
 0x476   :  { %v1519_v63 = vmul.f32 0.2, %v1511_v45  ;;  %v1535_v44 = vadd.f32 %v1531_v32, %v1354_v12  ;;  %v1475_v49 = vsel %vm1467_vm14, %v1463_v48, %v1471_v7  ;;  %v1499_v26 = vsel %vm1491_vm15, %v1487_v46, %v1495_v40 }
 0x477   :  { %v1552_v56 = vmax.f32 %v1528_v22, %v1548_v13  ;;  %v1455_v14 = vmax.f32 %v1431_v36, %v1451_v11  ;;  %v1350_v33 = vmul.f32 %v1345_v25, %v2152_v0  ;;  %v1390_v30 = vmul.f32 %v1345_v25, %v2159_v42 }
 0x478   :  { %vm1539_vm1 = vcmp.ge.f32.partialorder %v1535_v44, 0.0  ;;  %v1543_v4 = vmul.f32 0.2, %v1535_v44  ;;  %v1523_v60 = vsel %vm1515_vm0, %v1511_v45, %v1519_v63  ;;  %v1414_v41 = vmul.f32 %v1345_v25, %v2161_v39  ;;  %v1364_v46 = vpop.permute.xlu1 %1363 }
 0x479   :  { %v1479_v28 = vmax.f32 %v1455_v14, %v1475_v49  ;;  %v1438_v35 = vmul.f32 %v1345_v25, %v2168_v16  ;;  %1556 = vst [vmem:[%s2340_s8 + $0x8] sm:$0xff] %v1552_v56  ;;  %v1462_v32 = vmul.f32 %v1345_v25, %v2229_v18  ;;  %v1486_v21 = vmul.f32 %v1345_v25, %v2237_v57 }
 0x47a   :  { %v1547_v12 = vsel %vm1539_vm1, %v1535_v44, %v1543_v4  ;;  %v1374_v34 = vadd.f32 %v1369_v55, %v1350_v33  ;;  %v1394_v0 = vadd.f32 %v1390_v30, %v1369_v55  ;;  %v1418_v15 = vadd.f32 %v1414_v41, %v1369_v55 }
 0x47b   :  { %v1503_v2 = vmax.f32 %v1479_v28, %v1499_v26  ;;  %v1442_v42 = vadd.f32 %v1438_v35, %v1369_v55  ;;  %v1510_v20 = vmul.f32 %v1345_v25, %v2242_v37  ;;  %v1466_v31 = vadd.f32 %v1462_v32, %v1369_v55 }
 0x47c   :  { %vm1378_vm2 = vcmp.ge.f32.partialorder %v1374_v34, 0.0  ;;  %v1382_v39 = vmul.f32 0.2, %v1374_v34  ;;  %vm1398_vm3 = vcmp.ge.f32.partialorder %v1394_v0, 0.0  ;;  %v1402_v59 = vmul.f32 0.2, %v1394_v0 }
 0x47d   :  { %v1527_v16 = vmax.f32 %v1503_v2, %v1523_v60  ;;  %v1490_v1 = vadd.f32 %v1486_v21, %v1369_v55  ;;  %v1534_v9 = vmul.f32 %v1345_v25, %v2247_v53  ;;  %vm1422_vm4 = vcmp.ge.f32.partialorder %v1418_v15, 0.0 }
 0x47e   :  { %v1386_v18 = vsel %vm1378_vm2, %v1374_v34, %v1382_v39  ;;  %v1426_v57 = vmul.f32 0.2, %v1418_v15  ;;  %v1406_v62 = vsel %vm1398_vm3, %v1394_v0, %v1402_v59  ;;  %v1450_v23 = vmul.f32 0.2, %v1442_v42 }
 0x47f   :  { %v1551_v5 = vmax.f32 %v1527_v16, %v1547_v12  ;;  %v1474_v54 = vmul.f32 0.2, %v1466_v31  ;;  %v1410_v8 = vmax.f32 %v1386_v18, %v1406_v62  ;;  %vm1446_vm5 = vcmp.ge.f32.partialorder %v1442_v42, 0.0 }
 0x480   :  { %vm1470_vm6 = vcmp.ge.f32.partialorder %v1466_v31, 0.0  ;;  %v1430_v37 = vsel %vm1422_vm4, %v1418_v15, %v1426_v57  ;;  %v1498_v47 = vmul.f32 0.2, %v1490_v1  ;;  %v1514_v43 = vadd.f32 %v1510_v20, %v1369_v55 }
 0x481   :  { %v1538_v48 = vadd.f32 %v1534_v9, %v1369_v55  ;;  %1555 = vst [vmem:[%s2340_s8] sm:$0xff] %v1551_v5  ;;  %v1434_v61 = vmax.f32 %v1410_v8, %v1430_v37  ;;  %vm1494_vm7 = vcmp.ge.f32.partialorder %v1490_v1, 0.0  ;;  %v1454_v53 = vsel %vm1446_vm5, %v1442_v42, %v1450_v23 }
 0x482   :  { %v1478_v25 = vsel %vm1470_vm6, %v1466_v31, %v1474_v54  ;;  %v1522_v51 = vmul.f32 0.2, %v1514_v43  ;;  %vm1518_vm8 = vcmp.ge.f32.partialorder %v1514_v43, 0.0  ;;  %v1349_v29 = vmul.f32 %v1340_v58, %v2133_v52 }
 0x483   :  { %v1458_v45 = vmax.f32 %v1434_v61, %v1454_v53  ;;  %v1389_v38 = vmul.f32 %v1340_v58, %v2139_v27  ;;  %v1502_v6 = vsel %vm1494_vm7, %v1490_v1, %v1498_v47  ;;  %vm1542_vm9 = vcmp.ge.f32.partialorder %v1538_v48, 0.0 }
 0x484   :  { %v1413_v7 = vmul.f32 %v1340_v58, %v2141_v17  ;;  %v1437_v40 = vmul.f32 %v1340_v58, %v2148_v24  ;;  %v1546_v13 = vmul.f32 0.2, %v1538_v48  ;;  %v1373_v36 = vadd.f32 %v1364_v46, %v1349_v29 }
 0x485   :  { %v1482_v22 = vmax.f32 %v1458_v45, %v1478_v25  ;;  %v1393_v11 = vadd.f32 %v1389_v38, %v1364_v46  ;;  %v1526_v63 = vsel %vm1518_vm8, %v1514_v43, %v1522_v51  ;;  %v1461_v44 = vmul.f32 %v1340_v58, %v2210_v50 }
 0x486   :  { %v1417_v56 = vadd.f32 %v1413_v7, %v1364_v46  ;;  %v1441_v14 = vadd.f32 %v1437_v40, %v1364_v46  ;;  %vm1377_vm10 = vcmp.ge.f32.partialorder %v1373_v36, 0.0  ;;  %v1381_v52 = vmul.f32 0.2, %v1373_v36 }
 0x487   :  { %v1506_v49 = vmax.f32 %v1482_v22, %v1502_v6  ;;  %vm1397_vm11 = vcmp.ge.f32.partialorder %v1393_v11, 0.0  ;;  %v1485_v27 = vmul.f32 %v1340_v58, %v2217_v19  ;;  %v1401_v26 = vmul.f32 0.2, %v1393_v11 }
 0x488   :  { %v1425_v55 = vmul.f32 0.2, %v1417_v56  ;;  %v1465_v17 = vadd.f32 %v1461_v44, %v1364_v46  ;;  %v1509_v24 = vmul.f32 %v1340_v58, %v2222_v3  ;;  %v1385_v33 = vsel %vm1377_vm10, %v1373_v36, %v1381_v52 }
 0x489   :  { %v1530_v4 = vmax.f32 %v1506_v49, %v1526_v63  ;;  %vm1421_vm12 = vcmp.ge.f32.partialorder %v1417_v56, 0.0  ;;  %v1550_v30 = vsel %vm1542_vm9, %v1538_v48, %v1546_v13  ;;  %v1405_v28 = vsel %vm1397_vm11, %v1393_v11, %v1401_v26 }
 0x48a   :  { %v1449_v50 = vmul.f32 0.2, %v1441_v14  ;;  %v1489_v60 = vadd.f32 %v1485_v27, %v1364_v46  ;;  %v1409_v35 = vmax.f32 %v1385_v33, %v1405_v28  ;;  %vm1445_vm13 = vcmp.ge.f32.partialorder %v1441_v14, 0.0 }
 0x48b   :  { %v1554_v41 = vmax.f32 %v1530_v4, %v1550_v30  ;;  %v1533_v12 = vmul.f32 %v1340_v58, %v2225_v10  ;;  %v1429_v32 = vsel %vm1421_vm12, %v1417_v56, %v1425_v55  ;;  %v1473_v19 = vmul.f32 0.2, %v1465_v17 }
 0x48c   :  { %v1513_v21 = vadd.f32 %v1509_v24, %v1364_v46  ;;  %v1433_v3 = vmax.f32 %v1409_v35, %v1429_v32  ;;  %vm1469_vm14 = vcmp.ge.f32.partialorder %v1465_v17, 0.0  ;;  %v1453_v34 = vsel %vm1445_vm13, %v1441_v14, %v1449_v50 }
 0x48d   :  { %1558 = vst [vmem:[%s2340_s8 + $0x18] sm:$0xff] %v1554_v41  ;;  %v1497_v2 = vmul.f32 0.2, %v1489_v60  ;;  %v1537_v0 = vadd.f32 %v1533_v12, %v1364_v46  ;;  %vm1493_vm15 = vcmp.ge.f32.partialorder %v1489_v60, 0.0  ;;  %v1477_v42 = vsel %vm1469_vm14, %v1465_v17, %v1473_v19 }
 0x48e   :  { %v1457_v15 = vmax.f32 %v1433_v3, %v1453_v34  ;;  %v1521_v20 = vmul.f32 0.2, %v1513_v21  ;;  %vm1517_vm0 = vcmp.ge.f32.partialorder %v1513_v21, 0.0 }
 0x48f   :  { %v1501_v31 = vsel %vm1493_vm15, %v1489_v60, %v1497_v2  ;;  %v1545_v10 = vmul.f32 0.2, %v1537_v0  ;;  %vm1541_vm1 = vcmp.ge.f32.partialorder %v1537_v0, 0.0 }
 0x490   :  { %v1481_v39 = vmax.f32 %v1457_v15, %v1477_v42  ;;  %v1525_v58 = vsel %vm1517_vm0, %v1513_v21, %v1521_v20 }
 0x491   :  { %v1549_v1 = vsel %vm1541_vm1, %v1537_v0, %v1545_v10 }
 0x492   :  { %v1505_v16 = vmax.f32 %v1481_v39, %v1501_v31 }
 0x494   :  { %v1529_v59 = vmax.f32 %v1505_v16, %v1525_v58 }
 0x496   :  { %v1553_v9 = vmax.f32 %v1529_v59, %v1549_v1 }
 0x498   :  { %1557 = vst [vmem:[%s2340_s8 + $0x10] sm:$0xff] %v1553_v9 }

</bundles_post_ra>
